<compile_context>
chip_gen: v7x
topology: tpu7x:2x2x1
jax: 0.10.0
libtpu: 0.0.40
codegen_flags: <defaults>
</compile_context>

<pallas_src>
import functools

import jax
import jax.numpy as jnp
from jax.experimental import pallas as pl
from jax.experimental.pallas import tpu as pltpu

SELU_ALPHA = 1.6732632423543772
SELU_SCALE = 1.0507009873554805
LN_EPS = 1e-5


def _round_up(x, m):
    return (x + m - 1) // m * m


def _selu(x):
    return SELU_SCALE * jnp.where(x > 0, x, SELU_ALPHA * (jnp.exp(x) - 1.0))


def _layernorm(x, gamma, beta):
    # Plain LayerNorm over the last dim, biased variance (PyTorch semantics). Reference only.
    mean = jnp.mean(x, axis=-1, keepdims=True)
    xc = x - mean
    var = jnp.mean(xc * xc, axis=-1, keepdims=True)
    inv = jax.lax.rsqrt(var + LN_EPS)
    return xc * inv * gamma + beta


def _seg_layernorm(x, gamma, beta, mean_mat):
    # Segmented (per-32-lane-group) LayerNorm for batch-packed activations.
    # `mean_mat` is a constant block-diagonal matrix with 1/group_size inside each group
    # block, so x @ mean_mat is the per-group mean broadcast back to every lane of the
    # group.  Done on the MXU in f32, keeping the lanes dense (no 32-of-128-lane reduce).
    mean = jnp.dot(x, mean_mat, preferred_element_type=jnp.float32)
    xc = x - mean
    var = jnp.dot(xc * xc, mean_mat, preferred_element_type=jnp.float32)
    inv = jax.lax.rsqrt(var + LN_EPS)
    return xc * inv * gamma + beta


def _embedding_net_kernel(
    x_ref,                      # (tile_rows, P*d_in)               compute dtype
    w1_ref, b1_ref,             # (P*d_in, P*d_hid) cdt, (1, P*d_hid) f32
    skw_ref, skb_ref,           # (L, P*d_hid, P*d_hid) cdt, (L, 1, P*d_hid) f32
    lng_ref, lnb_ref,           # (L, 1, P*d_hid) f32 x2
    mh_ref,                     # (P*d_hid, P*d_hid) f32  segmented-mean matrix (hidden)
    w2_ref, b2_ref,             # (P*d_hid, P*d_embed) cdt, (1, P*d_embed) f32
    lng2_ref, lnb2_ref,         # (1, P*d_embed) f32 x2
    me_ref,                     # (P*d_embed, P*d_embed) f32  segmented-mean matrix (embed)
    wo_ref, bo_ref,             # (P*d_embed, P*d_out) cdt, (1, P*d_out) f32
    embed_ref,                  # (tile_rows, P*d_embed) f32   packed embedding
    out_ref,                    # (tile_rows, P*d_out) f32     packed head output
    *, n_layers,
):
    cdt = w1_ref.dtype  # matmul operand dtype (f32 default, bf16 optional)

    # First Linear + SELU (MXU matmul with f32 accumulation, f32 elementwise).
    h = jnp.dot(x_ref[...], w1_ref[...], preferred_element_type=jnp.float32)
    h = _selu(h + b1_ref[...])

    # Residual blocks: Linear -> LayerNorm -> SELU, plus skip connection.
    # Per-layer ref indexing keeps only one layer's weights live at a time.
    mh = mh_ref[...]
    for i in range(n_layers):  # n_layers is static -> unrolled
        y = jnp.dot(h.astype(cdt), skw_ref[i], preferred_element_type=jnp.float32)
        y = y + skb_ref[i]
        y = _selu(_seg_layernorm(y, lng_ref[i], lnb_ref[i], mh))
        h = h + y

    # Embedding head: Linear -> LayerNorm.  Stored as a lane-dense packed output.
    e = jnp.dot(h.astype(cdt), w2_ref[...], preferred_element_type=jnp.float32)
    e = _seg_layernorm(e + b2_ref[...], lng2_ref[...], lnb2_ref[...], me_ref[...])
    embed_ref[...] = e.astype(embed_ref.dtype)

    # Output head (block-diagonal), exact-width store — no padded slab / concatenate.
    o = jnp.dot(e.astype(cdt), wo_ref[...], preferred_element_type=jnp.float32)
    out_ref[...] = (o + bo_ref[...]).astype(out_ref.dtype)

    # TODO(synk): the PyTorch `if output.isnan().any(): breakpoint()` debug hook has no kernel equivalent.


def embedding_net_forward(x, params, *, n_layers, tile_m_cap=4096,
                          compute_dtype=jnp.float32,
                          vmem_budget_bytes=48 * 2**20):
    """x: (N, d_in). Returns {'embedding': (N, d_embed) f32, 'output': (N, d_out) f32}."""
    N, d_in = x.shape
    d_hid = params["w1"].shape[1]
    d_embed = params["w2"].shape[1]
    d_out = params["wo"].shape[1]
    cdt = jnp.dtype(compute_dtype)
    f32 = jnp.float32

    # Batch packing factor: put P rows side-by-side on the 128 lanes.
    P = max(1, 128 // d_hid)
    Pd_in, Pd_hid, Pd_emb, Pd_out = P * d_in, P * d_hid, P * d_embed, P * d_out
    n_stack = max(n_layers, 1)

    # --- VMEM footprint model (double-buffered I/O tiles + double-buffered weights). ---
    w_bytes = ((Pd_in * Pd_hid + n_layers * Pd_hid * Pd_hid
                + Pd_hid * Pd_emb + Pd_emb * Pd_out) * cdt.itemsize
               + (Pd_hid * Pd_hid + Pd_emb * Pd_emb) * 4               # segmented-mean mats
               + (Pd_hid * (1 + 3 * n_stack) + 3 * Pd_emb + Pd_out) * 4)

    def vmem_estimate(tile_rows):
        io = 2 * tile_rows * (Pd_in * cdt.itemsize + (Pd_emb + Pd_out) * 4)
        act = tile_rows * (4 * Pd_hid + 3 * Pd_emb + Pd_out) * 4       # rough live f32 acts
        return 2 * w_bytes + io + act

    # --- batch tile: grow to the largest size under the VMEM budget, keep >= 2 grid
    #     steps when the batch allows it (v7x: 2 TensorCores share the parallel axis),
    #     then rebalance the tile so padding rows are minimal. ---
    rows_unit = 8 * P                       # sublane granularity, in original rows
    N_unit = _round_up(N, rows_unit)
    tile_m = max(rows_unit, min(int(tile_m_cap), N_unit) // rows_unit * rows_unit)
    if N_unit >= 2 * rows_unit:
        tile_m = min(tile_m, max(rows_unit, (N_unit // 2) // rows_unit * rows_unit))
    while tile_m > rows_unit and vmem_estimate(tile_m // P) > vmem_budget_bytes:
        tile_m = max(rows_unit, (tile_m // 2) // rows_unit * rows_unit)
    n_steps = -(-N_unit // tile_m)
    tile_m = _round_up(-(-N_unit // n_steps), rows_unit)   # rebalance (never grows tile_m)
    tile_rows = tile_m // P
    N_pad = n_steps * tile_m
    vmem_limit = int(min(64 * 2**20, max(32 * 2**20, 2 * vmem_estimate(tile_rows))))

    # --- pack the input batch: [N, d_in] -> [N/P, P*d_in] (free row-major view). ---
    x_c = x.astype(cdt)
    if N_pad != N:
        x_c = jnp.concatenate([x_c, jnp.zeros((N_pad - N, d_in), cdt)], axis=0)
    x_p = x_c.reshape(N_pad // P, Pd_in)

    # --- weights: block-diagonal (P copies) so packed rows stay independent; biases and
    #     LayerNorm params tiled across the P groups; matmul operands in compute dtype. ---
    eye_p = jnp.eye(P, dtype=f32)

    def bdiag(w):                           # (a, b) -> block-diagonal (P*a, P*b)
        return jnp.kron(eye_p, w.astype(f32))

    def tile_p(v):                          # (..., d) -> (..., P*d)
        return jnp.tile(v.astype(f32), (1,) * (v.ndim - 1) + (P,))

    mean_hid = jnp.kron(eye_p, jnp.full((d_hid, d_hid), 1.0 / d_hid, f32))
    mean_emb = jnp.kron(eye_p, jnp.full((d_embed, d_embed), 1.0 / d_embed, f32))

    weight_args = (
        bdiag(params["w1"]).astype(cdt),
        tile_p(params["b1"].reshape(1, d_hid)),
        jnp.stack([bdiag(params["skw"][i]) for i in range(n_stack)]).astype(cdt),
        tile_p(params["skb"].reshape(n_stack, d_hid)).reshape(n_stack, 1, Pd_hid),
        tile_p(params["lng"].reshape(n_stack, d_hid)).reshape(n_stack, 1, Pd_hid),
        tile_p(params["lnb"].reshape(n_stack, d_hid)).reshape(n_stack, 1, Pd_hid),
        mean_hid,
        bdiag(params["w2"]).astype(cdt),
        tile_p(params["b2"].reshape(1, d_embed)),
        tile_p(params["lng2"].reshape(1, d_embed)),
        tile_p(params["lnb2"].reshape(1, d_embed)),
        mean_emb,
        bdiag(params["wo"]).astype(cdt),
        tile_p(params["bo"].reshape(1, d_out)),
    )

    kernel = functools.partial(_embedding_net_kernel, n_layers=n_layers)

    in_specs = [pl.BlockSpec((tile_rows, Pd_in), lambda i: (i, 0))]
    for a in weight_args:
        in_specs.append(pl.BlockSpec(a.shape, lambda i, _nd=a.ndim: (0,) * _nd))

    fwd = pl.pallas_call(
        kernel,
        out_shape=(jax.ShapeDtypeStruct((N_pad // P, Pd_emb), f32),
                   jax.ShapeDtypeStruct((N_pad // P, Pd_out), f32)),
        grid_spec=pltpu.PrefetchScalarGridSpec(
            num_scalar_prefetch=0,
            grid=(n_steps,),
            in_specs=in_specs,
            out_specs=[pl.BlockSpec((tile_rows, Pd_emb), lambda i: (i, 0)),
                       pl.BlockSpec((tile_rows, Pd_out), lambda i: (i, 0))],
        ),
        compiler_params=pltpu.CompilerParams(
            dimension_semantics=("parallel",),     # batch axis shards across TCs (v7x)
            vmem_limit_bytes=vmem_limit,
        ),
    )
    emb_p, out_p = fwd(x_p, *weight_args)

    # Unpack: [N/P, P*d] row-major view == [N, d] (free reshape, no padded columns).
    embed = emb_p.reshape(N_pad, d_embed)
    out = out_p.reshape(N_pad, d_out)
    if N_pad != N:
        embed, out = embed[:N], out[:N]
    return {"embedding": embed, "output": out}


def init_params(key, d_in, d_out, d_hid, d_embed, n_layers):
    """Deterministic synthetic init. Linear weights stored as [in, out] (transposed vs PyTorch)."""
    keys = jax.random.split(key, 8)

    def lin(k, fan_in, fan_out):
        bound = 1.0 / jnp.sqrt(fan_in)
        kw, kb = jax.random.split(k)
        w = jax.random.uniform(kw, (fan_in, fan_out), jnp.float32, -bound, bound)
        b = jax.random.uniform(kb, (1, fan_out), jnp.float32, -bound, bound)
        return w, b

    w1, b1 = lin(keys[0], d_in, d_hid)

    skw_list, skb_list = [], []
    skip_keys = jax.random.split(keys[1], max(n_layers, 1))
    for i in range(n_layers):
        w, b = lin(skip_keys[i], d_hid, d_hid)
        skw_list.append(w)
        skb_list.append(b[0])
    if n_layers > 0:
        skw = jnp.stack(skw_list)                     # (n_layers, d_hid, d_hid)
        skb = jnp.stack(skb_list)                     # (n_layers, d_hid)
    else:
        skw = jnp.zeros((1, d_hid, d_hid), jnp.float32)
        skb = jnp.zeros((1, d_hid), jnp.float32)
    lng = jnp.ones((max(n_layers, 1), d_hid), jnp.float32)    # LayerNorm weight init = 1
    lnb = jnp.zeros((max(n_layers, 1), d_hid), jnp.float32)   # LayerNorm bias init = 0

    w2, b2 = lin(keys[2], d_hid, d_embed)
    lng2 = jnp.ones((1, d_embed), jnp.float32)
    lnb2 = jnp.zeros((1, d_embed), jnp.float32)

    wo, bo = lin(keys[3], d_embed, d_out)

    return dict(w1=w1, b1=b1, skw=skw, skb=skb, lng=lng, lnb=lnb,
                w2=w2, b2=b2, lng2=lng2, lnb2=lnb2, wo=wo, bo=bo)


def reference_forward(x, params, n_layers):
    h = _selu(x @ params["w1"] + params["b1"])
    for i in range(n_layers):
        y = h @ params["skw"][i] + params["skb"][i]
        y = _selu(_layernorm(y, params["lng"][i], params["lnb"][i]))
        h = y + h
    e = _layernorm(h @ params["w2"] + params["b2"], params["lng2"], params["lnb2"])
    o = e @ params["wo"] + params["bo"]
    return e, o


if __name__ == "__main__":
    # Shapes consistent with the module's forward (2-D [batch, d_in] input).
    batch, d_in, d_hid, d_embed, d_out, n_layers = 512, 16, 32, 32, 8, 2

    key = jax.random.PRNGKey(0)
    kx, kp = jax.random.split(key)
    x = jax.random.normal(kx, (batch, d_in), jnp.float32)
    params = init_params(kp, d_in, d_out, d_hid, d_embed, n_layers)

    e_ref, o_ref = reference_forward(x, params, n_layers)

    # Default path (f32 matmul operands). Tolerance allows for XLA-vs-Mosaic default
    # f32 matmul precision-mode differences while still catching structural bugs.
    res = embedding_net_forward(x, params, n_layers=n_layers)
    jax.block_until_ready(res)
    assert res["embedding"].shape == (batch, d_embed)
    assert res["output"].shape == (batch, d_out)
    assert jnp.allclose(res["embedding"], e_ref, atol=2e-2, rtol=2e-2)
    assert jnp.allclose(res["output"], o_ref, atol=2e-2, rtol=2e-2)

    # Optional bf16-MXU-operand path (f32 accumulate/elementwise): loose sanity check.
    res_bf16 = embedding_net_forward(x, params, n_layers=n_layers,
                                     compute_dtype=jnp.bfloat16)
    jax.block_until_ready(res_bf16)
    assert jnp.allclose(res_bf16["embedding"], e_ref, atol=1e-1, rtol=1e-1)
    assert jnp.allclose(res_bf16["output"], o_ref, atol=1e-1, rtol=1e-1)

    print("KERNEL_OK")
</pallas_src>

<mosaic_0001>
module attributes {stable_mosaic.version = 11 : i64} {
  func.func @_embedding_net_kernel(%arg0: i32, %arg1: memref<64x64xf32, #tpu.memory_space<vmem>>, %arg2: memref<64x128xf32, #tpu.memory_space<vmem>>, %arg3: memref<1x128xf32, #tpu.memory_space<vmem>>, %arg4: memref<2x128x128xf32, #tpu.memory_space<vmem>>, %arg5: memref<2x1x128xf32, #tpu.memory_space<vmem>>, %arg6: memref<2x1x128xf32, #tpu.memory_space<vmem>>, %arg7: memref<2x1x128xf32, #tpu.memory_space<vmem>>, %arg8: memref<128x128xf32, #tpu.memory_space<vmem>>, %arg9: memref<128x128xf32, #tpu.memory_space<vmem>>, %arg10: memref<1x128xf32, #tpu.memory_space<vmem>>, %arg11: memref<1x128xf32, #tpu.memory_space<vmem>>, %arg12: memref<1x128xf32, #tpu.memory_space<vmem>>, %arg13: memref<128x128xf32, #tpu.memory_space<vmem>>, %arg14: memref<128x32xf32, #tpu.memory_space<vmem>>, %arg15: memref<1x32xf32, #tpu.memory_space<vmem>>, %arg16: memref<64x128xf32, #tpu.memory_space<vmem>>, %arg17: memref<64x32xf32, #tpu.memory_space<vmem>>) attributes {dimension_semantics = [#tpu.dimension_semantics<parallel>], iteration_bounds = array<i64: 2>, scalar_prefetch = 0 : i64, scratch_operands = 0 : i64, tpu.core_type = #tpu.core_type<tc>, window_params = [{transform_indices = @transform_0, window_bounds = array<i64: 64, 64>}, {pipeline_mode = #tpu.pipeline_mode<synchronous>, transform_indices = @transform_1, window_bounds = array<i64: 64, 128>}, {pipeline_mode = #tpu.pipeline_mode<synchronous>, transform_indices = @transform_2, window_bounds = array<i64: 1, 128>}, {pipeline_mode = #tpu.pipeline_mode<synchronous>, transform_indices = @transform_3, window_bounds = array<i64: 2, 128, 128>}, {pipeline_mode = #tpu.pipeline_mode<synchronous>, transform_indices = @transform_4, window_bounds = array<i64: 2, 1, 128>}, {pipeline_mode = #tpu.pipeline_mode<synchronous>, transform_indices = @transform_5, window_bounds = array<i64: 2, 1, 128>}, {pipeline_mode = #tpu.pipeline_mode<synchronous>, transform_indices = @transform_6, window_bounds = array<i64: 2, 1, 128>}, {pipeline_mode = #tpu.pipeline_mode<synchronous>, transform_indices = @transform_7, window_bounds = array<i64: 128, 128>}, {pipeline_mode = #tpu.pipeline_mode<synchronous>, transform_indices = @transform_8, window_bounds = array<i64: 128, 128>}, {pipeline_mode = #tpu.pipeline_mode<synchronous>, transform_indices = @transform_9, window_bounds = array<i64: 1, 128>}, {pipeline_mode = #tpu.pipeline_mode<synchronous>, transform_indices = @transform_10, window_bounds = array<i64: 1, 128>}, {pipeline_mode = #tpu.pipeline_mode<synchronous>, transform_indices = @transform_11, window_bounds = array<i64: 1, 128>}, {pipeline_mode = #tpu.pipeline_mode<synchronous>, transform_indices = @transform_12, window_bounds = array<i64: 128, 128>}, {pipeline_mode = #tpu.pipeline_mode<synchronous>, transform_indices = @transform_13, window_bounds = array<i64: 128, 32>}, {pipeline_mode = #tpu.pipeline_mode<synchronous>, transform_indices = @transform_14, window_bounds = array<i64: 1, 32>}, {transform_indices = @transform_15, window_bounds = array<i64: 64, 128>}, {transform_indices = @transform_16, window_bounds = array<i64: 64, 32>}]} {
    %c0 = arith.constant 0 : index
    %c0_0 = arith.constant 0 : index
    %0 = vector.load %arg1[%c0, %c0_0] : memref<64x64xf32, #tpu.memory_space<vmem>>, vector<64x64xf32>
    %c0_1 = arith.constant 0 : index
    %c0_2 = arith.constant 0 : index
    %1 = vector.load %arg2[%c0_1, %c0_2] : memref<64x128xf32, #tpu.memory_space<vmem>>, vector<64x128xf32>
    %cst = arith.constant dense<0.000000e+00> : vector<64x128xf32>
    %2 = tpu.matmul %0, %1, %cst {dimension_numbers = #tpu.dot_dimension_numbers<[1], [0], [0], [1], [0, 0, 1, 1], [], []>} : vector<64x64xf32>, vector<64x128xf32>, vector<64x128xf32> -> vector<64x128xf32>
    %c0_3 = arith.constant 0 : index
    %c0_4 = arith.constant 0 : index
    %3 = vector.load %arg3[%c0_3, %c0_4] : memref<1x128xf32, #tpu.memory_space<vmem>>, vector<1x128xf32>
    %4 = vector.broadcast %3 : vector<1x128xf32> to vector<64x128xf32>
    %5 = arith.addf %2, %4 : vector<64x128xf32>
    %cst_5 = arith.constant 0.000000e+00 : f32
    %6 = vector.broadcast %cst_5 : f32 to vector<64x128xf32>
    %7 = arith.cmpf ogt, %5, %6 : vector<64x128xf32>
    %8 = math.exp %5 : vector<64x128xf32>
    %cst_6 = arith.constant 1.000000e+00 : f32
    %9 = vector.broadcast %cst_6 : f32 to vector<64x128xf32>
    %10 = arith.subf %8, %9 : vector<64x128xf32>
    %cst_7 = arith.constant 1.67326319 : f32
    %11 = vector.broadcast %cst_7 : f32 to vector<64x128xf32>
    %12 = arith.mulf %11, %10 : vector<64x128xf32>
    %13 = arith.select %7, %5, %12 : vector<64x128xi1>, vector<64x128xf32>
    %cst_8 = arith.constant 1.05070102 : f32
    %14 = vector.broadcast %cst_8 : f32 to vector<64x128xf32>
    %15 = arith.mulf %14, %13 : vector<64x128xf32>
    %c0_9 = arith.constant 0 : index
    %c0_10 = arith.constant 0 : index
    %16 = vector.load %arg8[%c0_9, %c0_10] : memref<128x128xf32, #tpu.memory_space<vmem>>, vector<128x128xf32>
    %c0_11 = arith.constant 0 : index
    %c0_12 = arith.constant 0 : index
    %c0_13 = arith.constant 0 : index
    %17 = vector.load %arg4[%c0_11, %c0_12, %c0_13] : memref<2x128x128xf32, #tpu.memory_space<vmem>>, vector<1x128x128xf32>
    %18 = vector.shape_cast %17 : vector<1x128x128xf32> to vector<128x128xf32>
    %cst_14 = arith.constant dense<0.000000e+00> : vector<64x128xf32>
    %19 = tpu.matmul %15, %18, %cst_14 {dimension_numbers = #tpu.dot_dimension_numbers<[1], [0], [0], [1], [0, 0, 1, 1], [], []>} : vector<64x128xf32>, vector<128x128xf32>, vector<64x128xf32> -> vector<64x128xf32>
    %c0_15 = arith.constant 0 : index
    %c0_16 = arith.constant 0 : index
    %c0_17 = arith.constant 0 : index
    %20 = vector.load %arg5[%c0_15, %c0_16, %c0_17] : memref<2x1x128xf32, #tpu.memory_space<vmem>>, vector<1x1x128xf32>
    %21 = vector.shape_cast %20 : vector<1x1x128xf32> to vector<1x128xf32>
    %22 = vector.broadcast %21 : vector<1x128xf32> to vector<64x128xf32>
    %23 = arith.addf %19, %22 : vector<64x128xf32>
    %c0_18 = arith.constant 0 : index
    %c0_19 = arith.constant 0 : index
    %c0_20 = arith.constant 0 : index
    %24 = vector.load %arg6[%c0_18, %c0_19, %c0_20] : memref<2x1x128xf32, #tpu.memory_space<vmem>>, vector<1x1x128xf32>
    %25 = vector.shape_cast %24 : vector<1x1x128xf32> to vector<1x128xf32>
    %c0_21 = arith.constant 0 : index
    %c0_22 = arith.constant 0 : index
    %c0_23 = arith.constant 0 : index
    %26 = vector.load %arg7[%c0_21, %c0_22, %c0_23] : memref<2x1x128xf32, #tpu.memory_space<vmem>>, vector<1x1x128xf32>
    %27 = vector.shape_cast %26 : vector<1x1x128xf32> to vector<1x128xf32>
    %cst_24 = arith.constant dense<0.000000e+00> : vector<64x128xf32>
    %28 = tpu.matmul %23, %16, %cst_24 {dimension_numbers = #tpu.dot_dimension_numbers<[1], [0], [0], [1], [0, 0, 1, 1], [], []>} : vector<64x128xf32>, vector<128x128xf32>, vector<64x128xf32> -> vector<64x128xf32>
    %29 = arith.subf %23, %28 : vector<64x128xf32>
    %30 = arith.mulf %29, %29 : vector<64x128xf32>
    %cst_25 = arith.constant dense<0.000000e+00> : vector<64x128xf32>
    %31 = tpu.matmul %30, %16, %cst_25 {dimension_numbers = #tpu.dot_dimension_numbers<[1], [0], [0], [1], [0, 0, 1, 1], [], []>} : vector<64x128xf32>, vector<128x128xf32>, vector<64x128xf32> -> vector<64x128xf32>
    %cst_26 = arith.constant 9.99999974E-6 : f32
    %32 = vector.broadcast %cst_26 : f32 to vector<64x128xf32>
    %33 = arith.addf %31, %32 : vector<64x128xf32>
    %34 = math.rsqrt %33 : vector<64x128xf32>
    %35 = arith.mulf %29, %34 : vector<64x128xf32>
    %36 = vector.broadcast %25 : vector<1x128xf32> to vector<64x128xf32>
    %37 = arith.mulf %35, %36 : vector<64x128xf32>
    %38 = vector.broadcast %27 : vector<1x128xf32> to vector<64x128xf32>
    %39 = arith.addf %37, %38 : vector<64x128xf32>
    %cst_27 = arith.constant 0.000000e+00 : f32
    %40 = vector.broadcast %cst_27 : f32 to vector<64x128xf32>
    %41 = arith.cmpf ogt, %39, %40 : vector<64x128xf32>
    %42 = math.exp %39 : vector<64x128xf32>
    %cst_28 = arith.constant 1.000000e+00 : f32
    %43 = vector.broadcast %cst_28 : f32 to vector<64x128xf32>
    %44 = arith.subf %42, %43 : vector<64x128xf32>
    %cst_29 = arith.constant 1.67326319 : f32
    %45 = vector.broadcast %cst_29 : f32 to vector<64x128xf32>
    %46 = arith.mulf %45, %44 : vector<64x128xf32>
    %47 = arith.select %41, %39, %46 : vector<64x128xi1>, vector<64x128xf32>
    %cst_30 = arith.constant 1.05070102 : f32
    %48 = vector.broadcast %cst_30 : f32 to vector<64x128xf32>
    %49 = arith.mulf %48, %47 : vector<64x128xf32>
    %50 = arith.addf %15, %49 : vector<64x128xf32>
    %c1 = arith.constant 1 : index
    %c0_31 = arith.constant 0 : index
    %c0_32 = arith.constant 0 : index
    %51 = vector.load %arg4[%c1, %c0_31, %c0_32] : memref<2x128x128xf32, #tpu.memory_space<vmem>>, vector<1x128x128xf32>
    %52 = vector.shape_cast %51 : vector<1x128x128xf32> to vector<128x128xf32>
    %cst_33 = arith.constant dense<0.000000e+00> : vector<64x128xf32>
    %53 = tpu.matmul %50, %52, %cst_33 {dimension_numbers = #tpu.dot_dimension_numbers<[1], [0], [0], [1], [0, 0, 1, 1], [], []>} : vector<64x128xf32>, vector<128x128xf32>, vector<64x128xf32> -> vector<64x128xf32>
    %c1_34 = arith.constant 1 : index
    %c0_35 = arith.constant 0 : index
    %c0_36 = arith.constant 0 : index
    %54 = vector.load %arg5[%c1_34, %c0_35, %c0_36] : memref<2x1x128xf32, #tpu.memory_space<vmem>>, vector<1x1x128xf32>
    %55 = vector.shape_cast %54 : vector<1x1x128xf32> to vector<1x128xf32>
    %56 = vector.broadcast %55 : vector<1x128xf32> to vector<64x128xf32>
    %57 = arith.addf %53, %56 : vector<64x128xf32>
    %c1_37 = arith.constant 1 : index
    %c0_38 = arith.constant 0 : index
    %c0_39 = arith.constant 0 : index
    %58 = vector.load %arg6[%c1_37, %c0_38, %c0_39] : memref<2x1x128xf32, #tpu.memory_space<vmem>>, vector<1x1x128xf32>
    %59 = vector.shape_cast %58 : vector<1x1x128xf32> to vector<1x128xf32>
    %c1_40 = arith.constant 1 : index
    %c0_41 = arith.constant 0 : index
    %c0_42 = arith.constant 0 : index
    %60 = vector.load %arg7[%c1_40, %c0_41, %c0_42] : memref<2x1x128xf32, #tpu.memory_space<vmem>>, vector<1x1x128xf32>
    %61 = vector.shape_cast %60 : vector<1x1x128xf32> to vector<1x128xf32>
    %cst_43 = arith.constant dense<0.000000e+00> : vector<64x128xf32>
    %62 = tpu.matmul %57, %16, %cst_43 {dimension_numbers = #tpu.dot_dimension_numbers<[1], [0], [0], [1], [0, 0, 1, 1], [], []>} : vector<64x128xf32>, vector<128x128xf32>, vector<64x128xf32> -> vector<64x128xf32>
    %63 = arith.subf %57, %62 : vector<64x128xf32>
    %64 = arith.mulf %63, %63 : vector<64x128xf32>
    %cst_44 = arith.constant dense<0.000000e+00> : vector<64x128xf32>
    %65 = tpu.matmul %64, %16, %cst_44 {dimension_numbers = #tpu.dot_dimension_numbers<[1], [0], [0], [1], [0, 0, 1, 1], [], []>} : vector<64x128xf32>, vector<128x128xf32>, vector<64x128xf32> -> vector<64x128xf32>
    %cst_45 = arith.constant 9.99999974E-6 : f32
    %66 = vector.broadcast %cst_45 : f32 to vector<64x128xf32>
    %67 = arith.addf %65, %66 : vector<64x128xf32>
    %68 = math.rsqrt %67 : vector<64x128xf32>
    %69 = arith.mulf %63, %68 : vector<64x128xf32>
    %70 = vector.broadcast %59 : vector<1x128xf32> to vector<64x128xf32>
    %71 = arith.mulf %69, %70 : vector<64x128xf32>
    %72 = vector.broadcast %61 : vector<1x128xf32> to vector<64x128xf32>
    %73 = arith.addf %71, %72 : vector<64x128xf32>
    %cst_46 = arith.constant 0.000000e+00 : f32
    %74 = vector.broadcast %cst_46 : f32 to vector<64x128xf32>
    %75 = arith.cmpf ogt, %73, %74 : vector<64x128xf32>
    %76 = math.exp %73 : vector<64x128xf32>
    %cst_47 = arith.constant 1.000000e+00 : f32
    %77 = vector.broadcast %cst_47 : f32 to vector<64x128xf32>
    %78 = arith.subf %76, %77 : vector<64x128xf32>
    %cst_48 = arith.constant 1.67326319 : f32
    %79 = vector.broadcast %cst_48 : f32 to vector<64x128xf32>
    %80 = arith.mulf %79, %78 : vector<64x128xf32>
    %81 = arith.select %75, %73, %80 : vector<64x128xi1>, vector<64x128xf32>
    %cst_49 = arith.constant 1.05070102 : f32
    %82 = vector.broadcast %cst_49 : f32 to vector<64x128xf32>
    %83 = arith.mulf %82, %81 : vector<64x128xf32>
    %84 = arith.addf %50, %83 : vector<64x128xf32>
    %c0_50 = arith.constant 0 : index
    %c0_51 = arith.constant 0 : index
    %85 = vector.load %arg9[%c0_50, %c0_51] : memref<128x128xf32, #tpu.memory_space<vmem>>, vector<128x128xf32>
    %cst_52 = arith.constant dense<0.000000e+00> : vector<64x128xf32>
    %86 = tpu.matmul %84, %85, %cst_52 {dimension_numbers = #tpu.dot_dimension_numbers<[1], [0], [0], [1], [0, 0, 1, 1], [], []>} : vector<64x128xf32>, vector<128x128xf32>, vector<64x128xf32> -> vector<64x128xf32>
    %c0_53 = arith.constant 0 : index
    %c0_54 = arith.constant 0 : index
    %87 = vector.load %arg10[%c0_53, %c0_54] : memref<1x128xf32, #tpu.memory_space<vmem>>, vector<1x128xf32>
    %88 = vector.broadcast %87 : vector<1x128xf32> to vector<64x128xf32>
    %89 = arith.addf %86, %88 : vector<64x128xf32>
    %c0_55 = arith.constant 0 : index
    %c0_56 = arith.constant 0 : index
    %90 = vector.load %arg11[%c0_55, %c0_56] : memref<1x128xf32, #tpu.memory_space<vmem>>, vector<1x128xf32>
    %c0_57 = arith.constant 0 : index
    %c0_58 = arith.constant 0 : index
    %91 = vector.load %arg12[%c0_57, %c0_58] : memref<1x128xf32, #tpu.memory_space<vmem>>, vector<1x128xf32>
    %c0_59 = arith.constant 0 : index
    %c0_60 = arith.constant 0 : index
    %92 = vector.load %arg13[%c0_59, %c0_60] : memref<128x128xf32, #tpu.memory_space<vmem>>, vector<128x128xf32>
    %cst_61 = arith.constant dense<0.000000e+00> : vector<64x128xf32>
    %93 = tpu.matmul %89, %92, %cst_61 {dimension_numbers = #tpu.dot_dimension_numbers<[1], [0], [0], [1], [0, 0, 1, 1], [], []>} : vector<64x128xf32>, vector<128x128xf32>, vector<64x128xf32> -> vector<64x128xf32>
    %94 = arith.subf %89, %93 : vector<64x128xf32>
    %95 = arith.mulf %94, %94 : vector<64x128xf32>
    %cst_62 = arith.constant dense<0.000000e+00> : vector<64x128xf32>
    %96 = tpu.matmul %95, %92, %cst_62 {dimension_numbers = #tpu.dot_dimension_numbers<[1], [0], [0], [1], [0, 0, 1, 1], [], []>} : vector<64x128xf32>, vector<128x128xf32>, vector<64x128xf32> -> vector<64x128xf32>
    %cst_63 = arith.constant 9.99999974E-6 : f32
    %97 = vector.broadcast %cst_63 : f32 to vector<64x128xf32>
    %98 = arith.addf %96, %97 : vector<64x128xf32>
    %99 = math.rsqrt %98 : vector<64x128xf32>
    %100 = arith.mulf %94, %99 : vector<64x128xf32>
    %101 = vector.broadcast %90 : vector<1x128xf32> to vector<64x128xf32>
    %102 = arith.mulf %100, %101 : vector<64x128xf32>
    %103 = vector.broadcast %91 : vector<1x128xf32> to vector<64x128xf32>
    %104 = arith.addf %102, %103 : vector<64x128xf32>
    %c0_64 = arith.constant 0 : index
    %c0_65 = arith.constant 0 : index
    %105 = vector.load %arg16[%c0_64, %c0_65] : memref<64x128xf32, #tpu.memory_space<vmem>>, vector<64x128xf32>
    tpu.vector_store %arg16[%c0_64, %c0_65], %104 {strides = array<i32>} : memref<64x128xf32, #tpu.memory_space<vmem>>, vector<64x128xf32>,
    %c0_66 = arith.constant 0 : index
    %c0_67 = arith.constant 0 : index
    %106 = vector.load %arg14[%c0_66, %c0_67] : memref<128x32xf32, #tpu.memory_space<vmem>>, vector<128x32xf32>
    %cst_68 = arith.constant dense<0.000000e+00> : vector<64x32xf32>
    %107 = tpu.matmul %104, %106, %cst_68 {dimension_numbers = #tpu.dot_dimension_numbers<[1], [0], [0], [1], [0, 0, 1, 1], [], []>} : vector<64x128xf32>, vector<128x32xf32>, vector<64x32xf32> -> vector<64x32xf32>
    %c0_69 = arith.constant 0 : index
    %c0_70 = arith.constant 0 : index
    %108 = vector.load %arg15[%c0_69, %c0_70] : memref<1x32xf32, #tpu.memory_space<vmem>>, vector<1x32xf32>
    %109 = vector.broadcast %108 : vector<1x32xf32> to vector<64x32xf32>
    %110 = arith.addf %107, %109 : vector<64x32xf32>
    %c0_71 = arith.constant 0 : index
    %c0_72 = arith.constant 0 : index
    %111 = vector.load %arg17[%c0_71, %c0_72] : memref<64x32xf32, #tpu.memory_space<vmem>>, vector<64x32xf32>
    tpu.vector_store %arg17[%c0_71, %c0_72], %110 {strides = array<i32>} : memref<64x32xf32, #tpu.memory_space<vmem>>, vector<64x32xf32>,
    return
  }
  func.func @transform_0(%arg0: i32) -> (i32, i32) {
    %c0_i32 = arith.constant 0 : i32
    %c0_i32_0 = arith.constant 0 : i32
    return %arg0, %c0_i32 : i32, i32
  }
  func.func @transform_1(%arg0: i32) -> (i32, i32) {
    %c0_i32 = arith.constant 0 : i32
    %c0_i32_0 = arith.constant 0 : i32
    %c0_i32_1 = arith.constant 0 : i32
    return %c0_i32, %c0_i32_0 : i32, i32
  }
  func.func @transform_2(%arg0: i32) -> (i32, i32) {
    %c0_i32 = arith.constant 0 : i32
    %c0_i32_0 = arith.constant 0 : i32
    %c0_i32_1 = arith.constant 0 : i32
    return %c0_i32, %c0_i32_0 : i32, i32
  }
  func.func @transform_3(%arg0: i32) -> (i32, i32, i32) {
    %c0_i32 = arith.constant 0 : i32
    %c0_i32_0 = arith.constant 0 : i32
    %c0_i32_1 = arith.constant 0 : i32
    %c0_i32_2 = arith.constant 0 : i32
    return %c0_i32, %c0_i32_0, %c0_i32_1 : i32, i32, i32
  }
  func.func @transform_4(%arg0: i32) -> (i32, i32, i32) {
    %c0_i32 = arith.constant 0 : i32
    %c0_i32_0 = arith.constant 0 : i32
    %c0_i32_1 = arith.constant 0 : i32
    %c0_i32_2 = arith.constant 0 : i32
    return %c0_i32, %c0_i32_0, %c0_i32_1 : i32, i32, i32
  }
  func.func @transform_5(%arg0: i32) -> (i32, i32, i32) {
    %c0_i32 = arith.constant 0 : i32
    %c0_i32_0 = arith.constant 0 : i32
    %c0_i32_1 = arith.constant 0 : i32
    %c0_i32_2 = arith.constant 0 : i32
    return %c0_i32, %c0_i32_0, %c0_i32_1 : i32, i32, i32
  }
  func.func @transform_6(%arg0: i32) -> (i32, i32, i32) {
    %c0_i32 = arith.constant 0 : i32
    %c0_i32_0 = arith.constant 0 : i32
    %c0_i32_1 = arith.constant 0 : i32
    %c0_i32_2 = arith.constant 0 : i32
    return %c0_i32, %c0_i32_0, %c0_i32_1 : i32, i32, i32
  }
  func.func @transform_7(%arg0: i32) -> (i32, i32) {
    %c0_i32 = arith.constant 0 : i32
    %c0_i32_0 = arith.constant 0 : i32
    %c0_i32_1 = arith.constant 0 : i32
    return %c0_i32, %c0_i32_0 : i32, i32
  }
  func.func @transform_8(%arg0: i32) -> (i32, i32) {
    %c0_i32 = arith.constant 0 : i32
    %c0_i32_0 = arith.constant 0 : i32
    %c0_i32_1 = arith.constant 0 : i32
    return %c0_i32, %c0_i32_0 : i32, i32
  }
  func.func @transform_9(%arg0: i32) -> (i32, i32) {
    %c0_i32 = arith.constant 0 : i32
    %c0_i32_0 = arith.constant 0 : i32
    %c0_i32_1 = arith.constant 0 : i32
    return %c0_i32, %c0_i32_0 : i32, i32
  }
  func.func @transform_10(%arg0: i32) -> (i32, i32) {
    %c0_i32 = arith.constant 0 : i32
    %c0_i32_0 = arith.constant 0 : i32
    %c0_i32_1 = arith.constant 0 : i32
    return %c0_i32, %c0_i32_0 : i32, i32
  }
  func.func @transform_11(%arg0: i32) -> (i32, i32) {
    %c0_i32 = arith.constant 0 : i32
    %c0_i32_0 = arith.constant 0 : i32
    %c0_i32_1 = arith.constant 0 : i32
    return %c0_i32, %c0_i32_0 : i32, i32
  }
  func.func @transform_12(%arg0: i32) -> (i32, i32) {
    %c0_i32 = arith.constant 0 : i32
    %c0_i32_0 = arith.constant 0 : i32
    %c0_i32_1 = arith.constant 0 : i32
    return %c0_i32, %c0_i32_0 : i32, i32
  }
  func.func @transform_13(%arg0: i32) -> (i32, i32) {
    %c0_i32 = arith.constant 0 : i32
    %c0_i32_0 = arith.constant 0 : i32
    %c0_i32_1 = arith.constant 0 : i32
    return %c0_i32, %c0_i32_0 : i32, i32
  }
  func.func @transform_14(%arg0: i32) -> (i32, i32) {
    %c0_i32 = arith.constant 0 : i32
    %c0_i32_0 = arith.constant 0 : i32
    %c0_i32_1 = arith.constant 0 : i32
    return %c0_i32, %c0_i32_0 : i32, i32
  }
  func.func @transform_15(%arg0: i32) -> (i32, i32) {
    %c0_i32 = arith.constant 0 : i32
    %c0_i32_0 = arith.constant 0 : i32
    return %arg0, %c0_i32 : i32, i32
  }
  func.func @transform_16(%arg0: i32) -> (i32, i32) {
    %c0_i32 = arith.constant 0 : i32
    %c0_i32_0 = arith.constant 0 : i32
    return %arg0, %c0_i32 : i32, i32
  }
}

</mosaic_0001>

<bundles_post_ra>
// kernel: tpu_custom_call.1
= control target key start
LH: loop header
LB: loop body
LE: loop exit
PB: predicated region body
PF: predicated region fallthrough
CT: control target
= control target key end

     0   :  { %s5128_s0 = inlined_call_operand.vmem [shape: f32[128,64], index: 0, kind: input, shape index: {}]   ;;  %s5129_s1 = inlined_call_operand.hbm [shape: f32[64,128], index: 1, kind: input, shape index: {}]   ;;  %s5130_s2 = inlined_call_operand.vmem [shape: f32[1,128], index: 2, kind: input, shape index: {}]   ;;  %s5131_s3 = inlined_call_operand.vmem [shape: f32[2,128,128], index: 3, kind: input, shape index: {}]   ;;  %s5132_s4 = inlined_call_operand.vmem [shape: f32[2,1,128], index: 4, kind: input, shape index: {}]   ;;  %s5133_s5 = inlined_call_operand.vmem [shape: f32[2,1,128], index: 5, kind: input, shape index: {}]   ;;  %s5134_s6 = inlined_call_operand.hbm [shape: f32[2,1,128], index: 6, kind: input, shape index: {}]   ;;  %s5135_s7 = inlined_call_operand.hbm [shape: f32[128,128], index: 7, kind: input, shape index: {}]   ;;  %s5136_s8 = inlined_call_operand.hbm [shape: f32[128,128], index: 8, kind: input, shape index: {}]   ;;  %s5137_s9 = inlined_call_operand.hbm [shape: f32[1,128], index: 9, kind: input, shape index: {}]   ;;  %s5138_s10 = inlined_call_operand.hbm [shape: f32[1,128], index: 10, kind: input, shape index: {}]   ;;  %s5139_s11 = inlined_call_operand.hbm [shape: f32[1,128], index: 11, kind: input, shape index: {}]   ;;  %s5140_s12 = inlined_call_operand.vmem [shape: f32[128,128], index: 12, kind: input, shape index: {}]   ;;  %s5141_s13 = inlined_call_operand.vmem [shape: f32[128,32], index: 13, kind: input, shape index: {}]   ;;  %s5142_s14 = inlined_call_operand.vmem [shape: f32[1,32], index: 14, kind: input, shape index: {}]   ;;  %s5143_s15 = inlined_call_operand.hbm [shape: f32[128,128], index: 15, kind: output, shape index: {0}]   ;;  %s5144_s16 = inlined_call_operand.vmem [shape: f32[128,32], index: 16, kind: output, shape index: {1}]  }
   0x1   :  { %5160 = sst [smem:[#allocation28_spill]] %s5128_s0 }
   0x2   :  { %5161 = sst [smem:[#allocation29_spill]] %s5141_s13 }
   0x3   :  { %5162 = sst [smem:[#allocation30_spill]] %s5142_s14 }
   0x4   :  { %5163 = sst [smem:[#allocation31_spill]] %s5143_s15 }
   0x5   :  { %5164 = sst [smem:[#allocation32_spill]] %s5144_s16 }
   0x6   :  { %22 = vsyncpa [#allocation3], 0 }
   0x7   :  { %23 = vsyncpa [#allocation6], 0 }
   0x8   :  { %24 = vsyncpa [#allocation9], 0 }
   0x9   :  { %25 = vsyncpa [#allocation12], 0 }
   0xa   :  { %26 = vsyncpa [#allocation4], 0 }
   0xb   :  { %28 = vsyncpa [#allocation4 + $0x1], 0  ;;  %s4267_s21 = smov 0   ;;  %s4269_s22 = smov 0  }
   0xc   :  { %s4271_s23 = smov 0   ;;  %s4273_s24 = smov 0  }
   0xd LB: > { %5165 = sst [smem:[#allocation20_spill]] %s4154_s21  ;;  %s4288_s25 = sadd.s32 4294967295, %s4166_s24   ;;  %s4166_s24 = sphi %s4273_s24, %s5200_s24   ;;  %s4162_s23 = sphi %s4271_s23, %s5203_s23   ;;  %s4158_s22 = sphi %s4269_s22, %s5202_s22   ;;  %s4154_s21 = sphi %s4267_s21, %s5201_s21  }
   0xe   : > { %5166 = sst [smem:[#allocation21_spill]] %s4158_s22  ;;  %s2530_s26 = sadd.s32 4294967294, %s4166_s24  }
   0xf   : > { %5167 = sst [smem:[#allocation22_spill]] %s4162_s23  ;;  %s4292_s27 = sadd.s32 1, %s4166_s24  }
  0x10   : > { %5168 = sst [smem:[#allocation23_spill]] %s4166_s24  ;;  %s361_s28 = sadd.s32 1, %s4162_s23 }
  0x11   : > { %5169 = sst [smem:[#allocation24_spill]] %s4292_s27  ;;  %s358_s29 = ssub.s32 %s4166_s24, %s4292_s27 }
  0x12   : > { %p371_p0 = scmp.ne.s32.totalorder %s4162_s23, %s4158_s22  ;;  %p359_p1 = scmp.eq.s32.totalorder %s358_s29, 0 }
  0x13   : > { %p372_p2 = scmp.eq.s32.totalorder %s4288_s25, 1  ;;  %p377_p3 = scmp.ne.s32.totalorder %s4158_s22, %s4154_s21 }
  0x14   : > { %p378_p4 = scmp.eq.s32.totalorder %s2530_s26, 1  ;;  %p2531_p7 = scmp.ge.s32.totalorder %s4166_s24, 1 }
  0x15   : > { %s4303_s30 = scalar_select %p359_p1, %s4162_s23, %s361_s28  }
  0x16   : > { %p4305_p5 = por %p372_p2, %p371_p0  ;;  %p4309_p6 = por %p378_p4, %p377_p3 }
  0x17   : > { %5170 = sst [smem:[#allocation25_spill]] %s4303_s30  ;;  %p411_p8 = scmp.lt.s32.totalorder %s4166_s24, 3 }
  0x18   : > { %s5171_s0 = scalar_select %p4305_p5, 1, 0 }
  0x19   : > { %s5173_s17 = scalar_select %p4309_p6, 1, 0 }
  0x1a   : > { %5172 = sst [smem:[#allocation26_spill]] %s5171_s0  ;;  %p5151_p9 = scmp.eq.s32.totalorder %s4288_s25, 0 }
  0x1b   : > { %5174 = sst [smem:[#allocation27_spill]] %s5173_s17  ;;  %p4316_p10 = pnand %p2531_p7, %p411_p8 }
  0x1c   : > { %s4168_s19 = smov [#allocation5]   ;;  %s4169_s28 = smov [#allocation8]  }
  0x1d   : > { %s5175_s18 = scalar_select %p4316_p10, 1, 0 }
  0x1e   : > { %s448_s20 = sshll.u32 %s4168_s19, 4  ;;  %p3710_p11 = pneg %p4316_p10  ;;  %s449_s20 = int_to_ptr.vmem [resolvable:$true] %s448_s20 }
  0x1f   : > { %s474_s29 = sshll.u32 %s4169_s28, 4  ;;  %s3892_s27 = scalar_lea.hbm %s5134_s6, 32  ;;  %s475_s29 = int_to_ptr.vmem [resolvable:$true] %s474_s29 }
  0x20   : > { %p4324_p12 = pnand %p5151_p9, %p3710_p11  ;;  %p3893_p13 = scmp.ne.s32.totalorder %s5134_s6, %s3892_s27 }
  0x21   : > { %p3899_p3 = scmp.lt.u32.totalorder %s3892_s27, %s5134_s6 }
  0x22   : > { %p4336_p0 = pneg %p4324_p12 }
  0x24   : > { %p3895_p1 = pnand %p4336_p0, %p3893_p13 }
  0x26   : > { %p3896_p2 = pneg %p3895_p1 }
  0x28   : > { %p3901_p4 = pnand %p3899_p3, %p3896_p2 }
  0x2a   : > { %3904 = shalt.err (!%p3901_p4)
}
  0x2b   : > { %s3905_s23 = scalar_lea.vmem %s449_s20, 32  ;;  %p3913_p9 = scmp.lt.s32.totalorder %s449_s20, %s449_s20 }
  0x2c   : > { %p3906_p7 = scmp.ne.s32.totalorder %s449_s20, %s3905_s23  ;;  %p3914_p6 = scmp.lt.s32.totalorder %s3905_s23, %s3905_s23 }
  0x2e   : > { %p3908_p8 = pnand %p3906_p7, %p4336_p0  ;;  %p3915_p5 = por %p3914_p6, %p3913_p9 }
  0x30   : > { %p3909_p11 = pneg %p3908_p8 }
  0x32   : > { %p3916_p10 = pnand %p3915_p5, %p3909_p11 }
  0x34   : > { %3919 = shalt.err (!%p3916_p10)
}
  0x35   : > { %s4170_s21 = smov 16   ;;  %s4171_s30 = smov 1  }
  0x36   : > { %3716 = dma.hbm_to_vmem [thread:$0]  (!%p4324_p12), %s5134_s6, 32, %s449_s20, [#allocation6], %s4170_s21, %s4170_s21, %s4171_s30  }
  0x37   : > { %s4172_s27 = smov [#allocation11]   ;;  %s3920_s15 = scalar_lea.hbm %s5136_s8, 2048 }
  0x38   : > { %s499_s17 = sshll.u32 %s4172_s27, 4  ;;  %p3921_p5 = scmp.ne.s32.totalorder %s5136_s8, %s3920_s15  ;;  %s500_s17 = int_to_ptr.vmem [resolvable:$true] %s499_s17 }
  0x39   : > { %p3927_p10 = scmp.lt.u32.totalorder %s3920_s15, %s5136_s8 }
  0x3a   : > { %p3923_p6 = pnand %p3921_p5, %p4336_p0 }
  0x3c   : > { %p3924_p9 = pneg %p3923_p6 }
  0x3e   : > { %p3929_p13 = pnand %p3927_p10, %p3924_p9 }
  0x40   : > { %3932 = shalt.err (!%p3929_p13)
}
  0x41   : > { %s3933_s20 = scalar_lea.vmem %s475_s29, 2048  ;;  %p3941_p4 = scmp.lt.s32.totalorder %s475_s29, %s475_s29 }
  0x42   : > { %p3934_p1 = scmp.ne.s32.totalorder %s475_s29, %s3933_s20  ;;  %p3942_p7 = scmp.lt.s32.totalorder %s3933_s20, %s3933_s20 }
  0x44   : > { %p3936_p2 = pnand %p3934_p1, %p4336_p0  ;;  %p3943_p8 = por %p3942_p7, %p3941_p4 }
  0x46   : > { %p3937_p3 = pneg %p3936_p2 }
  0x48   : > { %p3944_p11 = pnand %p3943_p8, %p3937_p3 }
  0x4a   : > { %3947 = shalt.err (!%p3944_p11)
}
  0x4b   : > { %s4173_s14 = smov 128   ;;  %s4174_s0 = smov 8  }
  0x4c   : > { %3722 = dma.hbm_to_vmem [thread:$0]  (!%p4324_p12), %s5136_s8, 2048, %s475_s29, [#allocation9], %s4173_s14, %s4173_s14, %s4174_s0  }
  0x4d   : > { %s3948_s30 = scalar_lea.hbm %s5138_s10, 16 }
  0x4e   : > { %p3949_p5 = scmp.ne.s32.totalorder %s5138_s10, %s3948_s30  ;;  %p3955_p10 = scmp.lt.u32.totalorder %s3948_s30, %s5138_s10 }
  0x50   : > { %p3951_p6 = pnand %p3949_p5, %p4336_p0 }
  0x52   : > { %p3952_p9 = pneg %p3951_p6 }
  0x54   : > { %p3957_p13 = pnand %p3955_p10, %p3952_p9 }
  0x56   : > { %3960 = shalt.err (!%p3957_p13)
}
  0x57   : > { %s3961_s23 = scalar_lea.vmem %s500_s17, 16  ;;  %s3968_s29 = scalar_lea.vmem %s500_s17, 32 }
  0x58   : > { %p3962_p1 = scmp.ne.s32.totalorder %s500_s17, %s3961_s23  ;;  %p3969_p4 = scmp.lt.s32.totalorder %s500_s17, %s500_s17 }
  0x59   : > { %p3970_p7 = scmp.lt.s32.totalorder %s3968_s29, %s3961_s23 }
  0x5a   : > { %p3964_p2 = pnand %p3962_p1, %p4336_p0 }
  0x5b   : > { %p3971_p8 = por %p3970_p7, %p3969_p4 }
  0x5c   : > { %p3965_p3 = pneg %p3964_p2 }
  0x5e   : > { %p3972_p11 = pnand %p3971_p8, %p3965_p3 }
  0x60   : > { %3975 = shalt.err (!%p3972_p11)
}
  0x61   : > { %3728 = dma.hbm_to_vmem [thread:$0]  (!%p4324_p12), %s5138_s10, 16, %s500_s17, [#allocation12]  }
  0x62   : > { %s4175_s15 = smov [#allocation2]   ;;  %s4176_s21 = smov [#allocation7]  }
  0x63   : > { %s423_s22 = sshll.u32 %s4175_s15, 4  ;;  %s461_s30 = sshll.u32 %s4176_s21, 4  ;;  %s424_s22 = int_to_ptr.vmem [resolvable:$true] %s423_s22  ;;  %s462_s30 = int_to_ptr.vmem [resolvable:$true] %s461_s30 }
  0x64   : > { %s3976_s27 = scalar_lea.hbm %s5129_s1, 1024 }
  0x65   : > { %p3977_p5 = scmp.ne.s32.totalorder %s5129_s1, %s3976_s27  ;;  %p3983_p10 = scmp.lt.u32.totalorder %s3976_s27, %s5129_s1 }
  0x67   : > { %p3979_p6 = pnand %p3977_p5, %p4336_p0 }
  0x69   : > { %p3980_p9 = pneg %p3979_p6 }
  0x6b   : > { %p3985_p13 = pnand %p3983_p10, %p3980_p9 }
  0x6d   : > { %3988 = shalt.err (!%p3985_p13)
}
  0x6e   : > { %s3989_s17 = scalar_lea.vmem %s424_s22, 1024  ;;  %p3997_p4 = scmp.lt.s32.totalorder %s424_s22, %s424_s22 }
  0x6f   : > { %p3990_p1 = scmp.ne.s32.totalorder %s424_s22, %s3989_s17  ;;  %p3998_p7 = scmp.lt.s32.totalorder %s3989_s17, %s3989_s17 }
  0x71   : > { %p3992_p2 = pnand %p3990_p1, %p4336_p0  ;;  %p3999_p8 = por %p3998_p7, %p3997_p4 }
  0x73   : > { %p3993_p3 = pneg %p3992_p2 }
  0x75   : > { %p4000_p11 = pnand %p3999_p8, %p3993_p3 }
  0x77   : > { %4003 = shalt.err (!%p4000_p11)
}
  0x78   : > { %3713 = dma.hbm_to_vmem [thread:$0]  (!%p4324_p12), %s5129_s1, 1024, %s424_s22, [#allocation3], %s4173_s14, %s4173_s14, %s4174_s0  }
  0x79   : > { %s4004_s24 = scalar_lea.hbm %s5135_s7, 2048 }
  0x7a   : > { %p4005_p5 = scmp.ne.s32.totalorder %s5135_s7, %s4004_s24  ;;  %p4011_p10 = scmp.lt.u32.totalorder %s4004_s24, %s5135_s7 }
  0x7c   : > { %p4007_p6 = pnand %p4005_p5, %p4336_p0 }
  0x7e   : > { %p4008_p9 = pneg %p4007_p6 }
  0x80   : > { %p4013_p13 = pnand %p4011_p10, %p4008_p9 }
  0x82   : > { %4016 = shalt.err (!%p4013_p13)
}
  0x83   : > { %s4017_s20 = scalar_lea.vmem %s462_s30, 2048  ;;  %p4025_p4 = scmp.lt.s32.totalorder %s462_s30, %s462_s30 }
  0x84   : > { %p4018_p1 = scmp.ne.s32.totalorder %s462_s30, %s4017_s20  ;;  %p4026_p7 = scmp.lt.s32.totalorder %s4017_s20, %s4017_s20 }
  0x86   : > { %p4020_p2 = pnand %p4018_p1, %p4336_p0  ;;  %p4027_p8 = por %p4026_p7, %p4025_p4 }
  0x88   : > { %p4021_p3 = pneg %p4020_p2 }
  0x8a   : > { %p4028_p11 = pnand %p4027_p8, %p4021_p3 }
  0x8c   : > { %4031 = shalt.err (!%p4028_p11)
}
  0x8d   : > { %3719 = dma.hbm_to_vmem [thread:$0]  (!%p4324_p12), %s5135_s7, 2048, %s462_s30, [#allocation6], %s4173_s14, %s4173_s14, %s4174_s0  }
  0x8e   : > { %s4177_s13 = smov [#allocation10]   ;;  %s4178_s21 = smov [#allocation13]  }
  0x8f   : > { %s488_s15 = sshll.u32 %s4177_s13, 4  ;;  %s510_s16 = sshll.u32 %s4178_s21, 4  ;;  %s489_s15 = int_to_ptr.vmem [resolvable:$true] %s488_s15  ;;  %s511_s16 = int_to_ptr.vmem [resolvable:$true] %s510_s16 }
  0x90   : > { %s4032_s28 = scalar_lea.hbm %s5137_s9, 16 }
  0x91   : > { %p4033_p5 = scmp.ne.s32.totalorder %s5137_s9, %s4032_s28  ;;  %p4039_p10 = scmp.lt.u32.totalorder %s4032_s28, %s5137_s9 }
  0x93   : > { %p4035_p6 = pnand %p4033_p5, %p4336_p0 }
  0x95   : > { %p4036_p9 = pneg %p4035_p6 }
  0x97   : > { %p4041_p13 = pnand %p4039_p10, %p4036_p9 }
  0x99   : > { %4044 = shalt.err (!%p4041_p13)
}
  0x9a   : > { %s4045_s14 = scalar_lea.vmem %s489_s15, 16  ;;  %s4052_s0 = scalar_lea.vmem %s489_s15, 32 }
  0x9b   : > { %p4046_p1 = scmp.ne.s32.totalorder %s489_s15, %s4045_s14  ;;  %p4053_p4 = scmp.lt.s32.totalorder %s489_s15, %s489_s15 }
  0x9c   : > { %p4054_p7 = scmp.lt.s32.totalorder %s4052_s0, %s4045_s14 }
  0x9d   : > { %p4048_p2 = pnand %p4046_p1, %p4336_p0 }
  0x9e   : > { %p4055_p8 = por %p4054_p7, %p4053_p4 }
  0x9f   : > { %p4049_p3 = pneg %p4048_p2 }
  0xa1   : > { %p4056_p11 = pnand %p4055_p8, %p4049_p3 }
  0xa3   : > { %4059 = shalt.err (!%p4056_p11)
}
  0xa4   : > { %3725 = dma.hbm_to_vmem [thread:$0]  (!%p4324_p12), %s5137_s9, 16, %s489_s15, [#allocation9]  }
  0xa5   : > { %s4060_s24 = scalar_lea.hbm %s5139_s11, 16 }
  0xa6   : > { %p4061_p5 = scmp.ne.s32.totalorder %s5139_s11, %s4060_s24  ;;  %p4067_p10 = scmp.lt.u32.totalorder %s4060_s24, %s5139_s11 }
  0xa8   : > { %p4063_p6 = pnand %p4061_p5, %p4336_p0 }
  0xaa   : > { %p4064_p9 = pneg %p4063_p6 }
  0xac   : > { %p4069_p13 = pnand %p4067_p10, %p4064_p9 }
  0xae   : > { %4072 = shalt.err (!%p4069_p13)
}
  0xaf   : > { %s4073_s20 = scalar_lea.vmem %s511_s16, 16  ;;  %s4080_s15 = scalar_lea.vmem %s511_s16, 32 }
  0xb0   : > { %p4074_p1 = scmp.ne.s32.totalorder %s511_s16, %s4073_s20  ;;  %p4081_p4 = scmp.lt.s32.totalorder %s511_s16, %s511_s16 }
  0xb1   : > { %p4082_p7 = scmp.lt.s32.totalorder %s4080_s15, %s4073_s20 }
  0xb2   : > { %p4076_p2 = pnand %p4074_p1, %p4336_p0 }
  0xb3   : > { %p4083_p8 = por %p4082_p7, %p4081_p4 }
  0xb4   : > { %p4077_p3 = pneg %p4076_p2 }
  0xb6   : > { %p4084_p11 = pnand %p4083_p8, %p4077_p3 }
  0xb8   : > { %4087 = shalt.err (!%p4084_p11)
}
  0xb9   : > { %3731 = dma.hbm_to_vmem [thread:$0]  (!%p4324_p12), %s5139_s11, 16, %s511_s16, [#allocation12]  }
  0xba   : > { %p5178_p5 = scmp.ne.s32.totalorder %s5175_s18, 0 }
  0xbb   : > { %p5179_p6 = scmp.eq.s32.totalorder (!%p5178_p5), %s4288_s25, 0 }
  0xbc   : > { %541 = sbr.rel (%p5178_p5) target bundleno = 2734 (0xaae), region = 80 }
  0xc3   : > { %4133 = dma.done.wait (%p5179_p6), [#allocation3], 1024   ;;  %p5180_p0 = pmov %p5179_p6 }
  0xc5   : > { %4135 = vsyncadd (%p5180_p0), [#allocation3], 4294966272  ;;  %p5181_p9 = pmov %p5180_p0 }
  0xc6   : > { %p5182_p10 = pmov %p5180_p0 }
  0xc7   : > { %4137 = dma.done.wait (%p5181_p9), [#allocation6], 2080  }
  0xc8   : > { %4139 = vsyncadd (%p5182_p10), [#allocation6], 4294965216  ;;  %p5183_p13 = pmov %p5180_p0 }
  0xc9   : > { %p5184_p12 = pmov %p5180_p0 }
  0xca   : > { %4141 = dma.done.wait (%p5183_p13), [#allocation9], 2064  }
  0xcb   : > { %4143 = vsyncadd (%p5184_p12), [#allocation9], 4294965232  ;;  %p5185_p1 = pmov %p5180_p0 }
  0xcc   : > { %p5186_p2 = pmov %p5180_p0 }
  0xcd   : > { %4145 = dma.done.wait (%p5185_p1), [#allocation12], 32  }
  0xce   : > { %4147 = vsyncadd (%p5186_p2), [#allocation12], 4294967264  ;;  %s2549_s18 = sshll.u32 %s4288_s25, 3  ;;  %s5187_s0 = sld [smem:[#allocation28_spill]]  ;;  %v641_v0 = vld [vmem:[#allocation2] sm:$0xff]  ;;  %v642_v1 = vld [vmem:[#allocation2 + $0x8] sm:$0xff] }
  0xcf   : > { %p621_p3 = scmp.lt.s32.totalorder %s2549_s18, 15  ;;  %v643_v2 = vld [vmem:[#allocation2 + $0x10] sm:$0xff]  ;;  %vm656_vm0 = vcmask 523264   ;;  %v3344_v3 = vpack.c.bf16 %v642_v1, %v641_v0  ;;  %v644_v4 = vld [vmem:[#allocation2 + $0x18] sm:$0xff]  ;;  %v645_v6 = vld [vmem:[#allocation2 + $0x20] sm:$0xff]  ;;  %s5188_s19 = sld [smem:[#allocation29_spill]] }
  0xd0   : > { %v3348_v5 = vpack.c.bf16 %v644_v4, %v643_v2  ;;  %v646_v7 = vld [vmem:[#allocation2 + $0x28] sm:$0xff]  ;;  %v647_v10 = vld [vmem:[#allocation2 + $0x30] sm:$0xff]  ;;  %v858_v11 = vld [vmem:[%s5131_s3] sm:$0xff]  ;;  %s5189_s16 = sld [smem:[#allocation21_spill]]  ;;  %s5190_s13 = sld [smem:[#allocation26_spill]] }
  0xd1   : > { %s5205_s18 = smov (!%p621_p3, %s2549_s18), 15  ;;  %3345 = vmatprep.subr.bf16.mxu0 %v3344_v3  ;;  %v3352_v9 = vpack.c.bf16 %v646_v7, %v645_v6  ;;  %v859_v12 = vld [vmem:[%s5131_s3 + $0x8] sm:$0xff]  ;;  %v648_v13 = vld [vmem:[#allocation2 + $0x38] sm:$0xff]  ;;  %v860_v15 = vld [vmem:[%s5131_s3 + $0x10] sm:$0xff]  ;;  %s2619_s21 = sshll.u32 %s4288_s25, 10 }
  0xd2   : > { %s2550_s26 = sshll.u32 %s5205_s18, 3  ;;  %3347 = vmatpush3.bf16.msra.mxu0 %v3344_v3  ;;  %v3360_v14 = vpack.c.bf16 %v859_v12, %v858_v11  ;;  %v861_v16 = vld [vmem:[%s5131_s3 + $0x18] sm:$0xff]  ;;  %v3356_v18 = vpack.c.bf16 %v648_v13, %v647_v10  ;;  %v862_v26 = vld [vmem:[%s5131_s3 + $0x20] sm:$0xff]  ;;  %v863_v27 = vld [vmem:[%s5131_s3 + $0x28] sm:$0xff]  ;;  %s5191_s23 = sld [smem:[#allocation31_spill]] }
  0xd3   : > { %3349 = vmatprep.subr.bf16.mxu0 %v3348_v5  ;;  %v3364_v17 = vpack.c.bf16 %v861_v16, %v860_v15  ;;  %v3368_v28 = vpack.c.bf16 %v863_v27, %v862_v26  ;;  %v864_v29 = vld [vmem:[%s5131_s3 + $0x30] sm:$0xff]  ;;  %v865_v30 = vld [vmem:[%s5131_s3 + $0x38] sm:$0xff]  ;;  %v866_v32 = vld [vmem:[%s5131_s3 + $0x40] sm:$0xff]  ;;  %s4179_s25 = smov [#allocation14]  }
  0xd4   : > { %s4496_s30 = scalar_lea.vmem %s5187_s0, %s2550_s26  ;;  %3361 = vmatprep.subr.bf16.mxu1 %v3360_v14  ;;  %v3372_v31 = vpack.c.bf16 %v865_v30, %v864_v29  ;;  %v867_v33 = vld [vmem:[%s5131_s3 + $0x48] sm:$0xff]  ;;  %v868_v35 = vld [vmem:[%s5131_s3 + $0x50] sm:$0xff]  ;;  %v869_v36 = vld [vmem:[%s5131_s3 + $0x58] sm:$0xff]  ;;  %s4092_s14 = sshll.u32 %s4179_s25, 4  ;;  %s4093_s14 = int_to_ptr.vmem [resolvable:$false] %s4092_s14 }
  0xd5   : > { %v633_v8 = vld [vmem:[%s4496_s30] sm:$0xff]  ;;  %3363 = vmatpush3.bf16.msra.mxu1 %v3360_v14  ;;  %v634_v19 = vld [vmem:[%s4496_s30 + $0x8] sm:$0xff]  ;;  %v635_v20 = vld [vmem:[%s4496_s30 + $0x10] sm:$0xff]  ;;  %v3376_v34 = vpack.c.bf16 %v867_v33, %v866_v32  ;;  %v3380_v37 = vpack.c.bf16 %v869_v36, %v868_v35 }
  0xd6   : > { %2892 = vmatprep.mubr.msk.f32.mxu0 %vm656_vm0, %v633_v8  ;;  %3351 = vmatpush3.bf16.msra.mxu0 %v3348_v5  ;;  %v636_v21 = vld [vmem:[%s4496_s30 + $0x18] sm:$0xff]  ;;  %v637_v22 = vld [vmem:[%s4496_s30 + $0x20] sm:$0xff]  ;;  %v638_v23 = vld [vmem:[%s4496_s30 + $0x28] sm:$0xff]  ;;  %s610_s0 = sand.u32 1, %s5189_s16   ;;  %p5193_p7 = scmp.ne.s32.totalorder %s5190_s13, 0 }
  0xd7   : > { %3353 = vmatprep.subr.bf16.mxu0 %v3352_v9  ;;  %3365 = vmatprep.subr.bf16.mxu1 %v3364_v17  ;;  %v639_v24 = vld [vmem:[%s4496_s30 + $0x30] sm:$0xff]  ;;  %v640_v25 = vld [vmem:[%s4496_s30 + $0x38] sm:$0xff]  ;;  %v870_v38 = vld [vmem:[%s5131_s3 + $0x60] sm:$0xff]  ;;  %s2548_s17 = sshll.u32 %s610_s0, 6  ;;  %s5071_s15 = scalar_lea.sflag [#allocation4], %s610_s0 }
  0xd8   : > { %v871_v39 = vld [vmem:[%s5131_s3 + $0x68] sm:$0xff]  ;;  %v872_v41 = vld [vmem:[%s5131_s3 + $0x70] sm:$0xff]  ;;  %v873_v42 = vld [vmem:[%s5131_s3 + $0x78] sm:$0xff]  ;;  %s5046_s30 = scalar_lea.vmem [#allocation14], %s2548_s17  ;;  %s5192_s29 = smov %s5191_s23 }
  0xd9   : > { %3367 = vmatpush3.bf16.msra.mxu1 %v3364_v17  ;;  %v3384_v40 = vpack.c.bf16 %v871_v39, %v870_v38  ;;  %v3388_v43 = vpack.c.bf16 %v873_v42, %v872_v41  ;;  %v842_v44 = vld [vmem:[#allocation7] sm:$0xff]  ;;  %v843_v45 = vld [vmem:[#allocation7 + $0x8] sm:$0xff]  ;;  %v844_v46 = vld [vmem:[#allocation7 + $0x10] sm:$0xff]  ;;  %s2370_s24 = sshll.u32 %s5046_s30, 4  ;;  %s5065_s20 = scalar_lea.hbm %s5191_s23, %s2619_s21  ;;  %s5067_s24 = int_to_ptr.vmem [resolvable:$true] %s2370_s24 }
  0xda   : > { %3355 = vmatpush3.bf16.msra.mxu0 %v3352_v9  ;;  %3369 = vmatprep.subr.bf16.mxu1 %v3368_v28  ;;  %v4562_v47 = vpack.c.bf16 %v843_v45, %v842_v44  ;;  %v845_v48 = vld [vmem:[#allocation7 + $0x18] sm:$0xff]  ;;  %v846_v50 = vld [vmem:[#allocation7 + $0x20] sm:$0xff]  ;;  %v847_v51 = vld [vmem:[#allocation7 + $0x28] sm:$0xff]  ;;  %s4088_s22 = scalar_lea.vmem %s5067_s24, 1024  ;;  %s4094_s17 = scalar_lea.vmem %s4093_s14, 2048 }
  0xdb   : > { %3357 = vmatprep.subr.bf16.mxu0 %v3356_v18  ;;  %v4564_v49 = vpack.c.bf16 %v845_v48, %v844_v46  ;;  %v4570_v52 = vpack.c.bf16 %v847_v51, %v846_v50  ;;  %v848_v53 = vld [vmem:[#allocation7 + $0x30] sm:$0xff]  ;;  %v849_v54 = vld [vmem:[#allocation7 + $0x38] sm:$0xff]  ;;  %v850_v56 = vld [vmem:[#allocation7 + $0x40] sm:$0xff]  ;;  %p4089_p4 = scmp.ne.s32.totalorder %s5067_s24, %s4088_s22  ;;  %p4095_p5 = scmp.lt.s32.totalorder %s5067_s24, %s4093_s14 }
  0xdc   : > { %v4574_v55 = vpack.c.bf16 %v849_v54, %v848_v53  ;;  %v851_v57 = vld [vmem:[#allocation7 + $0x48] sm:$0xff]  ;;  %v852_v59 = vld [vmem:[#allocation7 + $0x50] sm:$0xff]  ;;  %v853_v60 = vld [vmem:[#allocation7 + $0x58] sm:$0xff]  ;;  %p4096_p6 = scmp.lt.s32.totalorder %s4094_s17, %s4088_s22 }
  0xdd   : > { %3371 = vmatpush3.bf16.msra.mxu1 %v3368_v28  ;;  %v4578_v58 = vpack.c.bf16 %v851_v57, %v850_v56  ;;  %v4582_v61 = vpack.c.bf16 %v853_v60, %v852_v59  ;;  %v854_v62 = vld [vmem:[#allocation7 + $0x60] sm:$0xff]  ;;  %v855_v63 = vld [vmem:[#allocation7 + $0x68] sm:$0xff]  ;;  %v2553_v1 = vld [vmem:[%s5130_s2] ss:$0 sm:$0xff]  ;;  %p4090_p8 = pnand %p4089_p4, %p5193_p7 }
  0xde   : > { %3359 = vmatpush3.bf16.msra.mxu0 %v3356_v18  ;;  %3373 = vmatprep.subr.bf16.mxu1 %v3372_v31  ;;  %v4586_v0 = vpack.c.bf16 %v855_v63, %v854_v62  ;;  %p4097_p0 = por %p4096_p6, %p4095_p5 }
  0xdf   : > { %3393 = vmatprep.subr.bf16.mxu0 %v4562_v47  ;;  %p4091_p11 = pneg %p4090_p8 }
  0xe1   : > { %2893 = vmatmul.mubr.msk.f32.vlgmr.msra.gmra.mrb[0].mxu0 %vm656_vm0, %v634_v19  ;;  %3375 = vmatpush3.bf16.msra.mxu1 %v3372_v31  ;;  %p4098_p9 = pnand %p4097_p0, %p4091_p11 }
  0xe2   : > { %2895 = vmatprep.mubr.msk.f32.mxu0 %vm656_vm0, %v635_v20  ;;  %3377 = vmatprep.subr.bf16.mxu1 %v3376_v34 }
  0xe3   : > { %3395 = vmatpush3.bf16.msra.mxu0 %v4562_v47 }
  0xe4   : > { %3397 = vmatprep.subr.bf16.mxu0 %v4564_v49 }
  0xe5   : > { %2896 = vmatmul.mubr.msk.f32.gmra.mrb[2].mxu0 %vm656_vm0, %v636_v21  ;;  %3379 = vmatpush3.bf16.msra.mxu1 %v3376_v34 }
  0xe6   : > { %2898 = vmatprep.mubr.msk.f32.mxu0 %vm656_vm0, %v637_v22  ;;  %3381 = vmatprep.subr.bf16.mxu1 %v3380_v37 }
  0xe7   : > { %3399 = vmatpush3.bf16.msra.mxu0 %v4564_v49 }
  0xe8   : > { %3401 = vmatprep.subr.bf16.mxu0 %v4570_v52 }
  0xe9   : > { %2899 = vmatmul.mubr.msk.f32.gmra.mrb[4].mxu0 %vm656_vm0, %v638_v23  ;;  %3383 = vmatpush3.bf16.msra.mxu1 %v3380_v37 }
  0xea   : > { %2901 = vmatprep.mubr.msk.f32.mxu0 %vm656_vm0, %v639_v24  ;;  %3385 = vmatprep.subr.bf16.mxu1 %v3384_v40 }
  0xeb   : > { %3403 = vmatpush3.bf16.msra.mxu0 %v4570_v52 }
  0xec   : > { %3405 = vmatprep.subr.bf16.mxu0 %v4574_v55 }
  0xed   : > { %2902 = vmatmul.mubr.msk.f32.gmra.mrb[6].mxu0 %vm656_vm0, %v640_v25  ;;  %3387 = vmatpush3.bf16.msra.mxu1 %v3384_v40 }
  0xee   : > { %3389 = vmatprep.subr.bf16.mxu1 %v3388_v43 }
  0xef   : > { %3407 = vmatpush3.bf16.msra.mxu0 %v4574_v55 }
  0xf0   : > { %3409 = vmatprep.subr.bf16.mxu0 %v4578_v58 }
  0xf1   : > { %3391 = vmatpush3.bf16.msra.mxu1 %v3388_v43 }
  0xf2   : > { %3425 = vmatprep.subr.bf16.mxu1 %v4562_v47 }
  0xf3   : > { %3411 = vmatpush3.bf16.msra.mxu0 %v4578_v58 }
  0xf4   : > { %3413 = vmatprep.subr.bf16.mxu0 %v4582_v61 }
  0xf7   : > { %3415 = vmatpush3.bf16.msra.mxu0 %v4582_v61 }
  0xf8   : > { %3417 = vmatprep.subr.bf16.mxu0 %v4586_v0 }
  0xfb   : > { %3419 = vmatpush3.bf16.msra.mxu0 %v4586_v0 }
 0x1b4   : > { %v2894_v2 = vpop.f32.mrb[0].mxu0 }
 0x1b5   : > { %v753_v3 = vadd.f32 %v2894_v2, %v2553_v1  ;;  %v747_v4 = vpop.f32.mrb[1].mxu0 }
 0x1b6   : > { %v748_v5 = vadd.f32 %v2553_v1, %v747_v4 }
 0x1b7   : > { %v796_v6 = vmul.f32 1.442695, %v753_v3  ;;  %vm787_vm1 = vcmp.gt.f32.partialorder %v753_v3, 0.0 }
 0x1b8   : > { %v794_v7 = vmul.f32 1.442695, %v748_v5  ;;  %v2897_v8 = vpop.f32.mrb[2].mxu0  ;;  %vm786_vm2 = vcmp.gt.f32.partialorder %v748_v5, 0.0 }
 0x1b9   : > { %3796 = vpow2.f32 %v796_v6  ;;  %v763_v9 = vadd.f32 %v2897_v8, %v2553_v1  ;;  %v757_v10 = vpop.f32.mrb[3].mxu0 }
 0x1ba   : > { %3798 = vpow2.f32 %v794_v7  ;;  %v758_v11 = vadd.f32 %v2553_v1, %v757_v10  ;;  %v857_v10 = vld [vmem:[#allocation7 + $0x78] sm:$0xff] }
 0x1bb   : > { %v800_v12 = vmul.f32 1.442695, %v763_v9  ;;  %vm789_vm3 = vcmp.gt.f32.partialorder %v763_v9, 0.0 }
 0x1bc   : > { %v798_v13 = vmul.f32 1.442695, %v758_v11  ;;  %v2900_v14 = vpop.f32.mrb[4].mxu0  ;;  %vm788_vm4 = vcmp.gt.f32.partialorder %v758_v11, 0.0 }
 0x1bd   : > { %3800 = vpow2.f32 %v800_v12  ;;  %v773_v15 = vadd.f32 %v2900_v14, %v2553_v1  ;;  %v767_v16 = vpop.f32.mrb[5].mxu0  ;;  %v2570_v12 = vld [vmem:[%s5132_s4] ss:$0 sm:$0xff] }
 0x1be   : > { %3802 = vpow2.f32 %v798_v13  ;;  %v768_v17 = vadd.f32 %v2553_v1, %v767_v16 }
 0x1bf   : > { %v804_v18 = vmul.f32 1.442695, %v773_v15  ;;  %vm791_vm5 = vcmp.gt.f32.partialorder %v773_v15, 0.0 }
 0x1c0   : > { %v802_v19 = vmul.f32 1.442695, %v768_v17  ;;  %v2903_v20 = vpop.f32.mrb[6].mxu0  ;;  %vm790_vm6 = vcmp.gt.f32.partialorder %v768_v17, 0.0 }
 0x1c1   : > { %3804 = vpow2.f32 %v804_v18  ;;  %v783_v21 = vadd.f32 %v2903_v20, %v2553_v1  ;;  %v777_v22 = vpop.f32.mrb[7].mxu0 }
 0x1c2   : > { %3806 = vpow2.f32 %v802_v19  ;;  %v778_v23 = vadd.f32 %v2553_v1, %v777_v22 }
 0x1c3   : > { %v3797_v24 = vpop.eup %3796  ;;  %v808_v25 = vmul.f32 1.442695, %v783_v21  ;;  %vm793_vm7 = vcmp.gt.f32.partialorder %v783_v21, 0.0 }
 0x1c4   : > { %v3799_v26 = vpop.eup %3798  ;;  %v2563_v27 = vadd.f32 -1.0, %v3797_v24  ;;  %v806_v28 = vmul.f32 1.442695, %v778_v23  ;;  %vm792_vm8 = vcmp.gt.f32.partialorder %v778_v23, 0.0 }
 0x1c5   : > { %3808 = vpow2.f32 %v808_v25  ;;  %v2562_v29 = vadd.f32 -1.0, %v3799_v26 }
 0x1c6   : > { %3810 = vpow2.f32 %v806_v28  ;;  %v819_v30 = vmul.f32 1.6732632, %v2563_v27 }
 0x1c7   : > { %v3801_v31 = vpop.eup %3800  ;;  %v818_v32 = vmul.f32 1.6732632, %v2562_v29 }
 0x1c8   : > { %v3803_v33 = vpop.eup %3802  ;;  %v2565_v34 = vadd.f32 -1.0, %v3801_v31  ;;  %v827_v35 = vsel %vm787_vm1, %v753_v3, %v819_v30 }
 0x1c9   : > { %v2564_v36 = vadd.f32 -1.0, %v3803_v33  ;;  %v826_v37 = vsel %vm786_vm2, %v748_v5, %v818_v32  ;;  %v4596_v41 = vmul.f32 1.050701, %v827_v35 }
 0x1ca   : > { %v4594_v38 = vmul.f32 1.050701, %v826_v37  ;;  %v821_v39 = vmul.f32 1.6732632, %v2565_v34 }
 0x1cb   : > { %v3805_v40 = vpop.eup %3804  ;;  %v820_v42 = vmul.f32 1.6732632, %v2564_v36 }
 0x1cc   : > { %v3807_v43 = vpop.eup %3806  ;;  %v2567_v44 = vadd.f32 -1.0, %v3805_v40  ;;  %2936 = vmatprep.mubr.f32.mxu1 %v4594_v38  ;;  %v829_v45 = vsel %vm789_vm3, %v763_v9, %v821_v39  ;;  %v856_v9 = vld [vmem:[#allocation7 + $0x70] sm:$0xff] }
 0x1cd   : > { %v2566_v46 = vadd.f32 -1.0, %v3807_v43  ;;  %2937 = vmatmul.mubr.f32.vlgmr.msra.gmra.mrb[0].mxu1 %v4596_v41  ;;  %v828_v48 = vsel %vm788_vm4, %v758_v11, %v820_v42  ;;  %v4603_v54 = vmul.f32 1.050701, %v829_v45  ;;  %v4631_v11 = vpack.c.bf16 %v857_v10, %v856_v9  ;;  %v2585_v10 = vld [vmem:[%s5131_s3 + $0xa0] sm:$0xff] }
 0x1ce   : > { %v4600_v50 = vmul.f32 1.050701, %v828_v48  ;;  %v823_v51 = vmul.f32 1.6732632, %v2567_v44  ;;  %3427 = vmatpush3.bf16.msra.mxu1 %v4562_v47 }
 0x1cf   : > { %v3809_v53 = vpop.eup %3808  ;;  %v822_v56 = vmul.f32 1.6732632, %v2566_v46  ;;  %3429 = vmatprep.subr.bf16.mxu1 %v4564_v49  ;;  %3421 = vmatprep.subr.bf16.mxu0 %v4631_v11 }
 0x1d0   : > { %v3811_v57 = vpop.eup %3810  ;;  %v2569_v59 = vadd.f32 -1.0, %v3809_v53  ;;  %2939 = vmatprep.mubr.f32.mxu1 %v4600_v50  ;;  %v831_v60 = vsel %vm791_vm5, %v773_v15, %v823_v51  ;;  %3423 = vmatpush3.bf16.msra.mxu0 %v4631_v11 }
 0x1d1   : > { %v2568_v62 = vadd.f32 -1.0, %v3811_v57  ;;  %2940 = vmatmul.mubr.f32.gmra.mrb[2].mxu1 %v4603_v54  ;;  %v830_v63 = vsel %vm790_vm6, %v768_v17, %v822_v56  ;;  %v4611_v3 = vmul.f32 1.050701, %v831_v60 }
 0x1d2   : > { %v4608_v1 = vmul.f32 1.050701, %v830_v63  ;;  %v825_v2 = vmul.f32 1.6732632, %v2569_v59  ;;  %3431 = vmatpush3.bf16.msra.mxu1 %v4564_v49  ;;  %v2581_v63 = vld [vmem:[%s5131_s3 + $0x80] sm:$0xff] }
 0x1d3   : > { %v824_v4 = vmul.f32 1.6732632, %v2568_v62  ;;  %3433 = vmatprep.subr.bf16.mxu1 %v4570_v52 }
 0x1d4   : > { %2942 = vmatprep.mubr.f32.mxu1 %v4608_v1  ;;  %v833_v5 = vsel %vm793_vm7, %v783_v21, %v825_v2  ;;  %v2582_v2 = vld [vmem:[%s5131_s3 + $0x88] sm:$0xff] }
 0x1d5   : > { %2943 = vmatmul.mubr.f32.gmra.mrb[4].mxu1 %v4611_v3  ;;  %v832_v6 = vsel %vm792_vm8, %v778_v23, %v824_v4  ;;  %v4619_v8 = vmul.f32 1.050701, %v833_v5  ;;  %v3456_v4 = vpack.c.bf16 %v2582_v2, %v2581_v63  ;;  %v2583_v5 = vld [vmem:[%s5131_s3 + $0x90] sm:$0xff] }
 0x1d6   : > { %v4616_v7 = vmul.f32 1.050701, %v832_v6  ;;  %3435 = vmatpush3.bf16.msra.mxu1 %v4570_v52  ;;  %v2584_v6 = vld [vmem:[%s5131_s3 + $0x98] sm:$0xff] }
 0x1d7   : > { %3437 = vmatprep.subr.bf16.mxu1 %v4574_v55  ;;  %3457 = vmatprep.subr.bf16.mxu0 %v3456_v4  ;;  %v3460_v9 = vpack.c.bf16 %v2584_v6, %v2583_v5  ;;  %v2572_v6 = vld [vmem:[#allocation5] ss:$0 sm:$0xff] }
 0x1d8   : > { %2945 = vmatprep.mubr.f32.mxu1 %v4616_v7 }
 0x1d9   : > { %2946 = vmatmul.mubr.f32.gmra.mrb[6].mxu1 %v4619_v8 }
 0x1da   : > { %3439 = vmatpush3.bf16.msra.mxu1 %v4574_v55 }
 0x1db   : > { %3441 = vmatprep.subr.bf16.mxu1 %v4578_v58 }
 0x1de   : > { %3443 = vmatpush3.bf16.msra.mxu1 %v4578_v58 }
 0x1df   : > { %3445 = vmatprep.subr.bf16.mxu1 %v4582_v61 }
 0x1e2   : > { %3447 = vmatpush3.bf16.msra.mxu1 %v4582_v61 }
 0x1e3   : > { %3449 = vmatprep.subr.bf16.mxu1 %v4586_v0 }
 0x1e6   : > { %3451 = vmatpush3.bf16.msra.mxu1 %v4586_v0 }
 0x1e7   : > { %3453 = vmatprep.subr.bf16.mxu1 %v4631_v11 }
 0x1ea   : > { %3455 = vmatpush3.bf16.msra.mxu1 %v4631_v11 }
 0x1eb   : > { %3489 = vmatprep.subr.bf16.mxu1 %v4562_v47 }
 0x2a0   : > { %v2938_v13 = vpop.f32.mrb[0].mxu1 }
 0x2a1   : > { %v947_v14 = vpop.f32.mrb[1].mxu1  ;;  %v953_v16 = vadd.f32 %v2938_v13, %v2570_v12 }
 0x2a2   : > { %v948_v15 = vadd.f32 %v2570_v12, %v947_v14  ;;  %v2587_v14 = vld [vmem:[%s5131_s3 + $0xb0] sm:$0xff] }
 0x2a4   : > { %v2941_v17 = vpop.f32.mrb[2].mxu1  ;;  %2980 = vmatprep.mubr.f32.mxu0 %v948_v15 }
 0x2a5   : > { %v957_v18 = vpop.f32.mrb[3].mxu1  ;;  %2981 = vmatmul.mubr.f32.vlgmr.msra.gmra.mrb[8].mxu0 %v953_v16  ;;  %v963_v20 = vadd.f32 %v2941_v17, %v2570_v12  ;;  %v2589_v17 = vld [vmem:[%s5131_s3 + $0xc0] sm:$0xff] }
 0x2a6   : > { %v958_v19 = vadd.f32 %v2570_v12, %v957_v18  ;;  %3459 = vmatpush3.bf16.msra.mxu0 %v3456_v4  ;;  %v2590_v18 = vld [vmem:[%s5131_s3 + $0xc8] sm:$0xff] }
 0x2a7   : > { %3461 = vmatprep.subr.bf16.mxu0 %v3460_v9 }
 0x2a8   : > { %v2944_v21 = vpop.f32.mrb[4].mxu1  ;;  %2983 = vmatprep.mubr.f32.mxu0 %v958_v19 }
 0x2a9   : > { %v967_v22 = vpop.f32.mrb[5].mxu1  ;;  %2984 = vmatmul.mubr.f32.gmra.mrb[10].mxu0 %v963_v20  ;;  %v973_v24 = vadd.f32 %v2944_v21, %v2570_v12  ;;  %v2592_v21 = vld [vmem:[%s5131_s3 + $0xd8] sm:$0xff] }
 0x2aa   : > { %v968_v23 = vadd.f32 %v2570_v12, %v967_v22  ;;  %3463 = vmatpush3.bf16.msra.mxu0 %v3460_v9  ;;  %v2593_v22 = vld [vmem:[%s5131_s3 + $0xe0] sm:$0xff] }
 0x2ac   : > { %v2947_v25 = vpop.f32.mrb[6].mxu1  ;;  %2986 = vmatprep.mubr.f32.mxu0 %v968_v23 }
 0x2ad   : > { %v977_v26 = vpop.f32.mrb[7].mxu1  ;;  %2987 = vmatmul.mubr.f32.gmra.mrb[12].mxu0 %v973_v24  ;;  %v983_v28 = vadd.f32 %v2947_v25, %v2570_v12 }
 0x2ae   : > { %v978_v27 = vadd.f32 %v2570_v12, %v977_v26  ;;  %v2586_v12 = vld [vmem:[%s5131_s3 + $0xa8] sm:$0xff]  ;;  %v2595_v26 = vld [vmem:[%s5131_s3 + $0xf0] sm:$0xff] }
 0x2af   : > { %v3464_v13 = vpack.c.bf16 %v2586_v12, %v2585_v10 }
 0x2b0   : > { %2989 = vmatprep.mubr.f32.mxu0 %v978_v27 }
 0x2b1   : > { %2990 = vmatmul.mubr.f32.gmra.mrb[14].mxu0 %v983_v28  ;;  %3465 = vmatprep.subr.bf16.mxu0 %v3464_v13 }
 0x2b2   : > { %3467 = vmatpush3.bf16.msra.mxu0 %v3464_v13 }
 0x378   : > { %v2982_v29 = vpop.f32.mrb[8].mxu0 }
 0x379   : > { %v4641_v30 = vsub.f32 %v953_v16, %v2982_v29  ;;  %v1054_v31 = vpop.f32.mrb[9].mxu0 }
 0x37a   : > { %v4643_v32 = vsub.f32 %v948_v15, %v1054_v31  ;;  %v2588_v15 = vld [vmem:[%s5131_s3 + $0xb8] sm:$0xff] }
 0x37b   : > { %v1102_v35 = vmul.f32 %v4641_v30, %v4641_v30  ;;  %v3468_v16 = vpack.c.bf16 %v2588_v15, %v2587_v14 }
 0x37c   : > { %v1101_v33 = vmul.f32 %v4643_v32, %v4643_v32  ;;  %v2985_v34 = vpop.f32.mrb[10].mxu0 }
 0x37d   : > { %v4649_v36 = vsub.f32 %v963_v20, %v2985_v34  ;;  %v1064_v37 = vpop.f32.mrb[11].mxu0  ;;  %3469 = vmatprep.subr.bf16.mxu0 %v3468_v16  ;;  %v2591_v20 = vld [vmem:[%s5131_s3 + $0xd0] sm:$0xff] }
 0x37e   : > { %v4651_v39 = vsub.f32 %v958_v19, %v1064_v37  ;;  %3024 = vmatprep.mubr.f32.mxu1 %v1101_v33  ;;  %3471 = vmatpush3.bf16.msra.mxu0 %v3468_v16  ;;  %v3472_v19 = vpack.c.bf16 %v2590_v18, %v2589_v17 }
 0x37f   : > { %3025 = vmatmul.mubr.f32.vlgmr.msra.gmra.mrb[8].mxu1 %v1102_v35  ;;  %v1104_v43 = vmul.f32 %v4649_v36, %v4649_v36 }
 0x380   : > { %v1103_v40 = vmul.f32 %v4651_v39, %v4651_v39  ;;  %v2988_v42 = vpop.f32.mrb[12].mxu0  ;;  %3491 = vmatpush3.bf16.msra.mxu1 %v4562_v47  ;;  %3473 = vmatprep.subr.bf16.mxu0 %v3472_v19 }
 0x381   : > { %v4658_v44 = vsub.f32 %v973_v24, %v2988_v42  ;;  %v1074_v45 = vpop.f32.mrb[13].mxu0  ;;  %3493 = vmatprep.subr.bf16.mxu1 %v4564_v49  ;;  %v2594_v24 = vld [vmem:[%s5131_s3 + $0xe8] sm:$0xff] }
 0x382   : > { %v4661_v46 = vsub.f32 %v968_v23, %v1074_v45  ;;  %3027 = vmatprep.mubr.f32.mxu1 %v1103_v40  ;;  %v3476_v23 = vpack.c.bf16 %v2592_v21, %v2591_v20  ;;  %3475 = vmatpush3.bf16.msra.mxu0 %v3472_v19  ;;  %v3480_v25 = vpack.c.bf16 %v2594_v24, %v2593_v22 }
 0x383   : > { %3028 = vmatmul.mubr.f32.gmra.mrb[10].mxu1 %v1104_v43  ;;  %v1106_v53 = vmul.f32 %v4658_v44, %v4658_v44 }
 0x384   : > { %v1105_v48 = vmul.f32 %v4661_v46, %v4661_v46  ;;  %v2991_v51 = vpop.f32.mrb[14].mxu0  ;;  %3495 = vmatpush3.bf16.msra.mxu1 %v4564_v49  ;;  %3477 = vmatprep.subr.bf16.mxu0 %v3476_v23 }
 0x385   : > { %v4668_v56 = vsub.f32 %v983_v28, %v2991_v51  ;;  %v1084_v57 = vpop.f32.mrb[15].mxu0  ;;  %3497 = vmatprep.subr.bf16.mxu1 %v4570_v52 }
 0x386   : > { %v4671_v59 = vsub.f32 %v978_v27, %v1084_v57  ;;  %3030 = vmatprep.mubr.f32.mxu1 %v1105_v48  ;;  %v2596_v27 = vld [vmem:[%s5131_s3 + $0xf8] sm:$0xff]  ;;  %3479 = vmatpush3.bf16.msra.mxu0 %v3476_v23 }
 0x387   : > { %3031 = vmatmul.mubr.f32.gmra.mrb[12].mxu1 %v1106_v53  ;;  %v1108_v62 = vmul.f32 %v4668_v56, %v4668_v56  ;;  %3481 = vmatprep.subr.bf16.mxu0 %v3480_v25  ;;  %v3484_v28 = vpack.c.bf16 %v2596_v27, %v2595_v26 }
 0x388   : > { %v1107_v60 = vmul.f32 %v4671_v59, %v4671_v59  ;;  %3499 = vmatpush3.bf16.msra.mxu1 %v4570_v52 }
 0x389   : > { %3501 = vmatprep.subr.bf16.mxu1 %v4574_v55 }
 0x38a   : > { %3033 = vmatprep.mubr.f32.mxu1 %v1107_v60  ;;  %3483 = vmatpush3.bf16.msra.mxu0 %v3480_v25  ;;  %v2571_v60 = vld [vmem:[%s5133_s5] ss:$0 sm:$0xff] }
 0x38b   : > { %3034 = vmatmul.mubr.f32.gmra.mrb[14].mxu1 %v1108_v62  ;;  %3485 = vmatprep.subr.bf16.mxu0 %v3484_v28 }
 0x38c   : > { %3503 = vmatpush3.bf16.msra.mxu1 %v4574_v55 }
 0x38d   : > { %3505 = vmatprep.subr.bf16.mxu1 %v4578_v58 }
 0x38e   : > { %3487 = vmatpush3.bf16.msra.mxu0 %v3484_v28 }
 0x38f   : > { %3521 = vmatprep.subr.bf16.mxu0 %v4562_v47 }
 0x390   : > { %3507 = vmatpush3.bf16.msra.mxu1 %v4578_v58 }
 0x391   : > { %3509 = vmatprep.subr.bf16.mxu1 %v4582_v61 }
 0x394   : > { %3511 = vmatpush3.bf16.msra.mxu1 %v4582_v61 }
 0x395   : > { %3513 = vmatprep.subr.bf16.mxu1 %v4586_v0 }
 0x398   : > { %3515 = vmatpush3.bf16.msra.mxu1 %v4586_v0 }
 0x399   : > { %3517 = vmatprep.subr.bf16.mxu1 %v4631_v11 }
 0x39c   : > { %3519 = vmatpush3.bf16.msra.mxu1 %v4631_v11 }
 0x452   : > { %v3026_v29 = vpop.f32.mrb[8].mxu1 }
 0x453   : > { %v1181_v31 = vadd.f32 1e-05, %v3026_v29  ;;  %v1175_v33 = vpop.f32.mrb[9].mxu1 }
 0x454   : > { %v1176_v34 = vadd.f32 1e-05, %v1175_v33 }
 0x455   : > { %3812 = vrsqrt.f32 %v1181_v31 }
 0x456   : > { %3814 = vrsqrt.f32 %v1176_v34  ;;  %v3029_v35 = vpop.f32.mrb[10].mxu1 }
 0x457   : > { %v1191_v37 = vadd.f32 1e-05, %v3029_v35  ;;  %v1185_v40 = vpop.f32.mrb[11].mxu1 }
 0x458   : > { %v1186_v42 = vadd.f32 1e-05, %v1185_v40 }
 0x459   : > { %3816 = vrsqrt.f32 %v1191_v37 }
 0x45a   : > { %3818 = vrsqrt.f32 %v1186_v42  ;;  %v3032_v43 = vpop.f32.mrb[12].mxu1 }
 0x45b   : > { %v1201_v45 = vadd.f32 1e-05, %v3032_v43  ;;  %v1195_v48 = vpop.f32.mrb[13].mxu1 }
 0x45c   : > { %v1196_v51 = vadd.f32 1e-05, %v1195_v48 }
 0x45d   : > { %3820 = vrsqrt.f32 %v1201_v45 }
 0x45e   : > { %3822 = vrsqrt.f32 %v1196_v51  ;;  %v3035_v53 = vpop.f32.mrb[14].mxu1 }
 0x45f   : > { %v3813_v57 = vpop.eup %3812  ;;  %v1211_v62 = vadd.f32 1e-05, %v3035_v53  ;;  %v1205_v63 = vpop.f32.mrb[15].mxu1 }
 0x460   : > { %v3815_v2 = vpop.eup %3814  ;;  %v1223_v4 = vmul.f32 %v3813_v57, %v4641_v30  ;;  %v1206_v5 = vadd.f32 1e-05, %v1205_v63 }
 0x461   : > { %v1222_v9 = vmul.f32 %v3815_v2, %v4643_v32  ;;  %3824 = vrsqrt.f32 %v1211_v62 }
 0x462   : > { %v1237_v10 = vmul.f32 %v2571_v60, %v1223_v4  ;;  %3826 = vrsqrt.f32 %v1206_v5 }
 0x463   : > { %v3817_v12 = vpop.eup %3816  ;;  %v1236_v13 = vmul.f32 %v2571_v60, %v1222_v9 }
 0x464   : > { %v3819_v14 = vpop.eup %3818  ;;  %v1251_v15 = vadd.f32 %v2572_v6, %v1237_v10  ;;  %v1225_v16 = vmul.f32 %v3817_v12, %v4649_v36 }
 0x465   : > { %v1224_v17 = vmul.f32 %v3819_v14, %v4651_v39  ;;  %v1250_v18 = vadd.f32 %v2572_v6, %v1236_v13 }
 0x466   : > { %v1268_v19 = vmul.f32 1.442695, %v1251_v15  ;;  %v1239_v20 = vmul.f32 %v2571_v60, %v1225_v16  ;;  %vm1259_vm9 = vcmp.gt.f32.partialorder %v1251_v15, 0.0 }
 0x467   : > { %v3821_v21 = vpop.eup %3820  ;;  %v1266_v30 = vmul.f32 1.442695, %v1250_v18  ;;  %v1238_v22 = vmul.f32 %v2571_v60, %v1224_v17  ;;  %vm1258_vm10 = vcmp.gt.f32.partialorder %v1250_v18, 0.0 }
 0x468   : > { %v3823_v23 = vpop.eup %3822  ;;  %3828 = vpow2.f32 %v1268_v19  ;;  %v1227_v32 = vmul.f32 %v3821_v21, %v4658_v44  ;;  %v1253_v24 = vadd.f32 %v2572_v6, %v1239_v20 }
 0x469   : > { %v1226_v25 = vmul.f32 %v3823_v23, %v4661_v46  ;;  %3830 = vpow2.f32 %v1266_v30  ;;  %v1252_v26 = vadd.f32 %v2572_v6, %v1238_v22 }
 0x46a   : > { %v1272_v27 = vmul.f32 1.442695, %v1253_v24  ;;  %v1241_v28 = vmul.f32 %v2571_v60, %v1227_v32  ;;  %vm1261_vm11 = vcmp.gt.f32.partialorder %v1253_v24, 0.0 }
 0x46b   : > { %v3825_v36 = vpop.eup %3824  ;;  %v1270_v29 = vmul.f32 1.442695, %v1252_v26  ;;  %v1240_v39 = vmul.f32 %v2571_v60, %v1226_v25  ;;  %vm1260_vm12 = vcmp.gt.f32.partialorder %v1252_v26, 0.0 }
 0x46c   : > { %v3827_v31 = vpop.eup %3826  ;;  %v1229_v33 = vmul.f32 %v3825_v36, %v4668_v56  ;;  %3832 = vpow2.f32 %v1272_v27  ;;  %v1255_v34 = vadd.f32 %v2572_v6, %v1241_v28 }
 0x46d   : > { %v1228_v35 = vmul.f32 %v3827_v31, %v4671_v59  ;;  %3834 = vpow2.f32 %v1270_v29  ;;  %v1254_v37 = vadd.f32 %v2572_v6, %v1240_v39 }
 0x46e   : > { %v1276_v44 = vmul.f32 1.442695, %v1255_v34  ;;  %v1243_v40 = vmul.f32 %v2571_v60, %v1229_v33  ;;  %vm1263_vm13 = vcmp.gt.f32.partialorder %v1255_v34, 0.0 }
 0x46f   : > { %v1274_v42 = vmul.f32 1.442695, %v1254_v37  ;;  %v1242_v46 = vmul.f32 %v2571_v60, %v1228_v35  ;;  %vm1262_vm14 = vcmp.gt.f32.partialorder %v1254_v37, 0.0 }
 0x470   : > { %3836 = vpow2.f32 %v1276_v44  ;;  %v4748_v43 = vadd.f32 %v2572_v6, %v1243_v40 }
 0x471   : > { %3838 = vpow2.f32 %v1274_v42  ;;  %v4750_v45 = vadd.f32 %v2572_v6, %v1242_v46 }
 0x472   : > { %v3829_v48 = vpop.eup %3828  ;;  %v1280_v51 = vmul.f32 1.442695, %v4748_v43  ;;  %vm1265_vm15 = vcmp.gt.f32.partialorder %v4748_v43, 0.0 }
 0x473   : > { %v3831_v56 = vpop.eup %3830  ;;  %v2574_v53 = vadd.f32 -1.0, %v3829_v48  ;;  %v1278_v57 = vmul.f32 1.442695, %v4750_v45  ;;  %vm1264_vm0 = vcmp.gt.f32.partialorder %v4750_v45, 0.0 }
 0x474   : > { %v2573_v59 = vadd.f32 -1.0, %v3831_v56  ;;  %3840 = vpow2.f32 %v1280_v51 }
 0x475   : > { %v1291_v62 = vmul.f32 1.6732632, %v2574_v53  ;;  %3842 = vpow2.f32 %v1278_v57 }
 0x476   : > { %v3833_v63 = vpop.eup %3832  ;;  %v1290_v2 = vmul.f32 1.6732632, %v2573_v59 }
 0x477   : > { %v3835_v60 = vpop.eup %3834  ;;  %v1299_v4 = vsel %vm1259_vm9, %v1251_v15, %v1291_v62  ;;  %v2576_v5 = vadd.f32 -1.0, %v3833_v63 }
 0x478   : > { %v1298_v6 = vsel %vm1258_vm10, %v1250_v18, %v1290_v2  ;;  %v1307_v9 = vmul.f32 1.050701, %v1299_v4  ;;  %v2575_v10 = vadd.f32 -1.0, %v3835_v60 }
 0x479   : > { %v1306_v12 = vmul.f32 1.050701, %v1298_v6  ;;  %v1293_v13 = vmul.f32 1.6732632, %v2576_v5 }
 0x47a   : > { %v3837_v14 = vpop.eup %3836  ;;  %v1292_v16 = vmul.f32 1.6732632, %v2575_v10  ;;  %v4758_v30 = vadd.f32 %v1307_v9, %v4596_v41 }
 0x47b   : > { %v3839_v17 = vpop.eup %3838  ;;  %v4755_v19 = vadd.f32 %v1306_v12, %v4594_v38  ;;  %v1301_v20 = vsel %vm1261_vm11, %v1253_v24, %v1293_v13  ;;  %v2578_v21 = vadd.f32 -1.0, %v3837_v14 }
 0x47c   : > { %v1300_v15 = vsel %vm1260_vm12, %v1252_v26, %v1292_v16  ;;  %v1309_v22 = vmul.f32 1.050701, %v1301_v20  ;;  %v2577_v18 = vadd.f32 -1.0, %v3839_v17 }
 0x47d   : > { %3068 = vmatprep.mubr.f32.mxu0 %v4755_v19  ;;  %v1308_v23 = vmul.f32 1.050701, %v1300_v15  ;;  %v1295_v32 = vmul.f32 1.6732632, %v2578_v21 }
 0x47e   : > { %v3841_v25 = vpop.eup %3840  ;;  %3069 = vmatmul.mubr.f32.vlgmr.msra.gmra.mrb[16].mxu0 %v4758_v30  ;;  %v1294_v27 = vmul.f32 1.6732632, %v2577_v18  ;;  %v4767_v26 = vadd.f32 %v1309_v22, %v4603_v54 }
 0x47f   : > { %v3843_v38 = vpop.eup %3842  ;;  %v4763_v28 = vadd.f32 %v1308_v23, %v4600_v50  ;;  %v1303_v24 = vsel %vm1263_vm13, %v1255_v34, %v1295_v32  ;;  %v2580_v41 = vadd.f32 -1.0, %v3841_v25  ;;  %3523 = vmatpush3.bf16.msra.mxu0 %v4562_v47  ;;  %v1790_v25 = vld [vmem:[#allocation8] sm:$0xff] }
 0x480   : > { %v1302_v36 = vsel %vm1262_vm14, %v1254_v37, %v1294_v27  ;;  %v1311_v29 = vmul.f32 1.050701, %v1303_v24  ;;  %v2579_v39 = vadd.f32 -1.0, %v3843_v38  ;;  %3525 = vmatprep.subr.bf16.mxu0 %v4564_v49  ;;  %v1791_v27 = vld [vmem:[#allocation8 + $0x8] sm:$0xff]  ;;  %v1792_v24 = vld [vmem:[#allocation8 + $0x10] sm:$0xff] }
 0x481   : > { %3071 = vmatprep.mubr.f32.mxu0 %v4763_v28  ;;  %v1310_v31 = vmul.f32 1.050701, %v1302_v36  ;;  %v1297_v33 = vmul.f32 1.6732632, %v2580_v41  ;;  %v3552_v38 = vpack.c.bf16 %v1791_v27, %v1790_v25  ;;  %v1793_v41 = vld [vmem:[#allocation8 + $0x18] sm:$0xff] }
 0x482   : > { %3072 = vmatmul.mubr.f32.gmra.mrb[18].mxu0 %v4767_v26  ;;  %v1296_v50 = vmul.f32 1.6732632, %v2579_v39  ;;  %v4780_v54 = vadd.f32 %v1311_v29, %v4611_v3  ;;  %v3556_v36 = vpack.c.bf16 %v1793_v41, %v1792_v24  ;;  %v1794_v29 = vld [vmem:[#allocation8 + $0x20] sm:$0xff]  ;;  %v1795_v39 = vld [vmem:[#allocation8 + $0x28] sm:$0xff] }
 0x483   : > { %v4774_v34 = vadd.f32 %v1310_v31, %v4608_v1  ;;  %v1305_v47 = vsel %vm1265_vm15, %v4748_v43, %v1297_v33  ;;  %3527 = vmatpush3.bf16.msra.mxu0 %v4564_v49  ;;  %3553 = vmatprep.subr.bf16.mxu1 %v3552_v38  ;;  %v3560_v31 = vpack.c.bf16 %v1795_v39, %v1794_v29  ;;  %v1796_v33 = vld [vmem:[#allocation8 + $0x30] sm:$0xff] }
 0x484   : > { %v1304_v35 = vsel %vm1264_vm0, %v4750_v45, %v1296_v50  ;;  %v1313_v37 = vmul.f32 1.050701, %v1305_v47  ;;  %3529 = vmatprep.subr.bf16.mxu0 %v4570_v52  ;;  %v1797_v50 = vld [vmem:[#allocation8 + $0x38] sm:$0xff] }
 0x485   : > { %3074 = vmatprep.mubr.f32.mxu0 %v4774_v34  ;;  %v1312_v44 = vmul.f32 1.050701, %v1304_v35  ;;  %v3564_v47 = vpack.c.bf16 %v1797_v50, %v1796_v33  ;;  %v1798_v35 = vld [vmem:[#allocation8 + $0x40] sm:$0xff] }
 0x486   : > { %3075 = vmatmul.mubr.f32.gmra.mrb[20].mxu0 %v4780_v54  ;;  %v4791_v49 = vadd.f32 %v1313_v37, %v4619_v8  ;;  %v1799_v37 = vld [vmem:[#allocation8 + $0x48] sm:$0xff] }
 0x487   : > { %v4787_v1 = vadd.f32 %v1312_v44, %v4616_v7  ;;  %3531 = vmatpush3.bf16.msra.mxu0 %v4570_v52  ;;  %v2598_v52 = vld [vmem:[%s5132_s4 + $0x1] ss:$0 sm:$0xff]  ;;  %v3568_v44 = vpack.c.bf16 %v1799_v37, %v1798_v35 }
 0x488   : > { %3533 = vmatprep.subr.bf16.mxu0 %v4574_v55 }
 0x489   : > { %3077 = vmatprep.mubr.f32.mxu0 %v4787_v1 }
 0x48a   : > { %3078 = vmatmul.mubr.f32.gmra.mrb[22].mxu0 %v4791_v49 }
 0x48b   : > { %3535 = vmatpush3.bf16.msra.mxu0 %v4574_v55 }
 0x48c   : > { %3537 = vmatprep.subr.bf16.mxu0 %v4578_v58 }
 0x48f   : > { %3539 = vmatpush3.bf16.msra.mxu0 %v4578_v58 }
 0x490   : > { %3541 = vmatprep.subr.bf16.mxu0 %v4582_v61 }
 0x493   : > { %3543 = vmatpush3.bf16.msra.mxu0 %v4582_v61 }
 0x494   : > { %3545 = vmatprep.subr.bf16.mxu0 %v4586_v0 }
 0x497   : > { %3547 = vmatpush3.bf16.msra.mxu0 %v4586_v0 }
 0x498   : > { %3549 = vmatprep.subr.bf16.mxu0 %v4631_v11 }
 0x49b   : > { %3551 = vmatpush3.bf16.msra.mxu0 %v4631_v11 }
 0x551   : > { %v3070_v55 = vpop.f32.mrb[16].mxu0 }
 0x552   : > { %v1413_v3 = vpop.f32.mrb[17].mxu0  ;;  %v1419_v58 = vadd.f32 %v3070_v55, %v2598_v52  ;;  %v1801_v55 = vld [vmem:[#allocation8 + $0x58] sm:$0xff] }
 0x553   : > { %v1414_v7 = vadd.f32 %v2598_v52, %v1413_v3  ;;  %v1802_v3 = vld [vmem:[#allocation8 + $0x60] sm:$0xff] }
 0x555   : > { %v3073_v8 = vpop.f32.mrb[18].mxu0  ;;  %3112 = vmatprep.mubr.f32.mxu1 %v1414_v7 }
 0x556   : > { %v1423_v40 = vpop.f32.mrb[19].mxu0  ;;  %3113 = vmatmul.mubr.f32.vlgmr.msra.gmra.mrb[16].mxu1 %v1419_v58  ;;  %v1429_v42 = vadd.f32 %v3073_v8, %v2598_v52 }
 0x557   : > { %v1424_v61 = vadd.f32 %v2598_v52, %v1423_v40  ;;  %3555 = vmatpush3.bf16.msra.mxu1 %v3552_v38  ;;  %v1804_v40 = vld [vmem:[#allocation8 + $0x70] sm:$0xff] }
 0x558   : > { %3557 = vmatprep.subr.bf16.mxu1 %v3556_v36 }
 0x559   : > { %v3076_v46 = vpop.f32.mrb[20].mxu0  ;;  %3115 = vmatprep.mubr.f32.mxu1 %v1424_v61 }
 0x55a   : > { %v1433_v0 = vpop.f32.mrb[21].mxu0  ;;  %3116 = vmatmul.mubr.f32.gmra.mrb[18].mxu1 %v1429_v42  ;;  %v1439_v11 = vadd.f32 %v3076_v46, %v2598_v52  ;;  %v1920_v46 = vld [vmem:[%s5140_s12] sm:$0xff] }
 0x55b   : > { %v1434_v43 = vadd.f32 %v2598_v52, %v1433_v0  ;;  %3559 = vmatpush3.bf16.msra.mxu1 %v3556_v36  ;;  %v1921_v0 = vld [vmem:[%s5140_s12 + $0x8] sm:$0xff] }
 0x55c   : > { %3561 = vmatprep.subr.bf16.mxu1 %v3560_v31 }
 0x55d   : > { %v3079_v45 = vpop.f32.mrb[22].mxu0  ;;  %3118 = vmatprep.mubr.f32.mxu1 %v1434_v43 }
 0x55e   : > { %v1443_v48 = vpop.f32.mrb[23].mxu0  ;;  %3119 = vmatmul.mubr.f32.gmra.mrb[20].mxu1 %v1439_v11  ;;  %v1449_v56 = vadd.f32 %v3079_v45, %v2598_v52  ;;  %v1923_v45 = vld [vmem:[%s5140_s12 + $0x18] sm:$0xff] }
 0x55f   : > { %v1444_v51 = vadd.f32 %v2598_v52, %v1443_v48  ;;  %3563 = vmatpush3.bf16.msra.mxu1 %v3560_v31  ;;  %v1800_v52 = vld [vmem:[#allocation8 + $0x50] sm:$0xff] }
 0x560   : > { %3565 = vmatprep.subr.bf16.mxu1 %v3564_v47 }
 0x561   : > { %3121 = vmatprep.mubr.f32.mxu1 %v1444_v51 }
 0x562   : > { %3122 = vmatmul.mubr.f32.gmra.mrb[22].mxu1 %v1449_v56 }
 0x563   : > { %3567 = vmatpush3.bf16.msra.mxu1 %v3564_v47  ;;  %v2600_v47 = vld [vmem:[%s5133_s5 + $0x1] ss:$0 sm:$0xff] }
 0x564   : > { %3569 = vmatprep.subr.bf16.mxu1 %v3568_v44 }
 0x567   : > { %3571 = vmatpush3.bf16.msra.mxu1 %v3568_v44 }
 0x629   : > { %v3114_v53 = vpop.f32.mrb[16].mxu1 }
 0x62a   : > { %v4808_v57 = vsub.f32 %v1419_v58, %v3114_v53  ;;  %v1522_v59 = vpop.f32.mrb[17].mxu1  ;;  %v1803_v58 = vld [vmem:[#allocation8 + $0x68] sm:$0xff] }
 0x62b   : > { %v4810_v62 = vsub.f32 %v1414_v7, %v1522_v59  ;;  %v3572_v7 = vpack.c.bf16 %v1801_v55, %v1800_v52  ;;  %v3576_v8 = vpack.c.bf16 %v1803_v58, %v1802_v3  ;;  %v1926_v59 = vld [vmem:[%s5140_s12 + $0x30] sm:$0xff]  ;;  %v2601_v3 = vld [vmem:[#allocation5 + $0x1] ss:$0 sm:$0xff] }
 0x62c   : > { %v1570_v60 = vmul.f32 %v4808_v57, %v4808_v57 }
 0x62d   : > { %v1569_v63 = vmul.f32 %v4810_v62, %v4810_v62  ;;  %v3117_v2 = vpop.f32.mrb[18].mxu1  ;;  %3573 = vmatprep.subr.bf16.mxu1 %v3572_v7 }
 0x62e   : > { %v4816_v4 = vsub.f32 %v1429_v42, %v3117_v2  ;;  %v1532_v5 = vpop.f32.mrb[19].mxu1  ;;  %3575 = vmatpush3.bf16.msra.mxu1 %v3572_v7 }
 0x62f   : > { %v4818_v6 = vsub.f32 %v1424_v61, %v1532_v5  ;;  %3156 = vmatprep.mubr.f32.mxu0 %v1569_v63  ;;  %v1805_v61 = vld [vmem:[#allocation8 + $0x78] sm:$0xff]  ;;  %3577 = vmatprep.subr.bf16.mxu1 %v3576_v8  ;;  %v1929_v5 = vld [vmem:[%s5140_s12 + $0x48] sm:$0xff] }
 0x630   : > { %3157 = vmatmul.mubr.f32.vlgmr.msra.gmra.mrb[24].mxu0 %v1570_v60  ;;  %v1572_v12 = vmul.f32 %v4816_v4, %v4816_v4  ;;  %v3580_v42 = vpack.c.bf16 %v1805_v61, %v1804_v40  ;;  %v1927_v63 = vld [vmem:[%s5140_s12 + $0x38] sm:$0xff]  ;;  %v1928_v60 = vld [vmem:[%s5140_s12 + $0x40] sm:$0xff] }
 0x631   : > { %v1571_v9 = vmul.f32 %v4818_v6, %v4818_v6  ;;  %v3120_v10 = vpop.f32.mrb[20].mxu1  ;;  %v4876_v2 = vpack.c.bf16 %v1927_v63, %v1926_v59 }
 0x632   : > { %v4824_v13 = vsub.f32 %v1439_v11, %v3120_v10  ;;  %v1542_v14 = vpop.f32.mrb[21].mxu1  ;;  %3579 = vmatpush3.bf16.msra.mxu1 %v3576_v8  ;;  %v4849_v11 = vpack.c.bf16 %v1921_v0, %v1920_v46  ;;  %v1930_v10 = vld [vmem:[%s5140_s12 + $0x50] sm:$0xff] }
 0x633   : > { %v4826_v16 = vsub.f32 %v1434_v43, %v1542_v14  ;;  %3159 = vmatprep.mubr.f32.mxu0 %v1571_v9  ;;  %3581 = vmatprep.subr.bf16.mxu1 %v3580_v42  ;;  %v1922_v43 = vld [vmem:[%s5140_s12 + $0x10] sm:$0xff]  ;;  %v4886_v9 = vpack.c.bf16 %v1929_v5, %v1928_v60 }
 0x634   : > { %3160 = vmatmul.mubr.f32.gmra.mrb[26].mxu0 %v1572_v12  ;;  %v1574_v21 = vmul.f32 %v4824_v13, %v4824_v13  ;;  %v4854_v48 = vpack.c.bf16 %v1923_v45, %v1922_v43  ;;  %3585 = vmatprep.subr.bf16.mxu0 %v4849_v11  ;;  %v1931_v12 = vld [vmem:[%s5140_s12 + $0x58] sm:$0xff] }
 0x635   : > { %v1573_v17 = vmul.f32 %v4826_v16, %v4826_v16  ;;  %v3123_v20 = vpop.f32.mrb[22].mxu1  ;;  %3587 = vmatpush3.bf16.msra.mxu0 %v4849_v11  ;;  %v4896_v14 = vpack.c.bf16 %v1931_v12, %v1930_v10 }
 0x636   : > { %v4832_v15 = vsub.f32 %v1449_v56, %v3123_v20  ;;  %v1552_v22 = vpop.f32.mrb[23].mxu1  ;;  %3583 = vmatpush3.bf16.msra.mxu1 %v3580_v42  ;;  %v1925_v56 = vld [vmem:[%s5140_s12 + $0x28] sm:$0xff]  ;;  %3589 = vmatprep.subr.bf16.mxu0 %v4854_v48 }
 0x637   : > { %v4834_v18 = vsub.f32 %v1444_v51, %v1552_v22  ;;  %3162 = vmatprep.mubr.f32.mxu0 %v1573_v17  ;;  %v1924_v51 = vld [vmem:[%s5140_s12 + $0x20] sm:$0xff]  ;;  %3617 = vmatprep.subr.bf16.mxu1 %v4849_v11  ;;  %v1933_v20 = vld [vmem:[%s5140_s12 + $0x68] sm:$0xff] }
 0x638   : > { %3163 = vmatmul.mubr.f32.gmra.mrb[28].mxu0 %v1574_v21  ;;  %v1576_v32 = vmul.f32 %v4832_v15, %v4832_v15  ;;  %v4866_v53 = vpack.c.bf16 %v1925_v56, %v1924_v51  ;;  %v1932_v17 = vld [vmem:[%s5140_s12 + $0x60] sm:$0xff] }
 0x639   : > { %v1575_v23 = vmul.f32 %v4834_v18, %v4834_v18  ;;  %3591 = vmatpush3.bf16.msra.mxu0 %v4854_v48  ;;  %v4906_v21 = vpack.c.bf16 %v1933_v20, %v1932_v17 }
 0x63a   : > { %3593 = vmatprep.subr.bf16.mxu0 %v4866_v53 }
 0x63b   : > { %3165 = vmatprep.mubr.f32.mxu0 %v1575_v23 }
 0x63c   : > { %3166 = vmatmul.mubr.f32.gmra.mrb[30].mxu0 %v1576_v32 }
 0x63d   : > { %3595 = vmatpush3.bf16.msra.mxu0 %v4866_v53 }
 0x63e   : > { %3597 = vmatprep.subr.bf16.mxu0 %v4876_v2 }
 0x641   : > { %3599 = vmatpush3.bf16.msra.mxu0 %v4876_v2 }
 0x642   : > { %3601 = vmatprep.subr.bf16.mxu0 %v4886_v9 }
 0x645   : > { %3603 = vmatpush3.bf16.msra.mxu0 %v4886_v9 }
 0x646   : > { %3605 = vmatprep.subr.bf16.mxu0 %v4896_v14 }
 0x649   : > { %3607 = vmatpush3.bf16.msra.mxu0 %v4896_v14 }
 0x64a   : > { %3609 = vmatprep.subr.bf16.mxu0 %v4906_v21 }
 0x64d   : > { %3611 = vmatpush3.bf16.msra.mxu0 %v4906_v21 }
 0x703   : > { %v3158_v22 = vpop.f32.mrb[24].mxu0 }
 0x704   : > { %v1649_v23 = vadd.f32 1e-05, %v3158_v22  ;;  %v1643_v32 = vpop.f32.mrb[25].mxu0 }
 0x705   : > { %v1644_v25 = vadd.f32 1e-05, %v1643_v32 }
 0x706   : > { %3844 = vrsqrt.f32 %v1649_v23 }
 0x707   : > { %3846 = vrsqrt.f32 %v1644_v25  ;;  %v3161_v27 = vpop.f32.mrb[26].mxu0 }
 0x708   : > { %v1659_v38 = vadd.f32 1e-05, %v3161_v27  ;;  %v1653_v24 = vpop.f32.mrb[27].mxu0 }
 0x709   : > { %v1654_v41 = vadd.f32 1e-05, %v1653_v24 }
 0x70a   : > { %3848 = vrsqrt.f32 %v1659_v38 }
 0x70b   : > { %3850 = vrsqrt.f32 %v1654_v41  ;;  %v3164_v36 = vpop.f32.mrb[28].mxu0 }
 0x70c   : > { %v1669_v29 = vadd.f32 1e-05, %v3164_v36  ;;  %v1663_v39 = vpop.f32.mrb[29].mxu0 }
 0x70d   : > { %v1664_v31 = vadd.f32 1e-05, %v1663_v39 }
 0x70e   : > { %3852 = vrsqrt.f32 %v1669_v29 }
 0x70f   : > { %3854 = vrsqrt.f32 %v1664_v31  ;;  %v3167_v33 = vpop.f32.mrb[30].mxu0 }
 0x710   : > { %v3845_v50 = vpop.eup %3844  ;;  %v1679_v35 = vadd.f32 1e-05, %v3167_v33  ;;  %v1673_v37 = vpop.f32.mrb[31].mxu0 }
 0x711   : > { %v3847_v44 = vpop.eup %3846  ;;  %v1691_v52 = vmul.f32 %v3845_v50, %v4808_v57  ;;  %v1674_v55 = vadd.f32 1e-05, %v1673_v37 }
 0x712   : > { %v1690_v7 = vmul.f32 %v3847_v44, %v4810_v62  ;;  %3856 = vrsqrt.f32 %v1679_v35 }
 0x713   : > { %v1705_v58 = vmul.f32 %v2600_v47, %v1691_v52  ;;  %3858 = vrsqrt.f32 %v1674_v55 }
 0x714   : > { %v3849_v8 = vpop.eup %3848  ;;  %v1704_v40 = vmul.f32 %v2600_v47, %v1690_v7 }
 0x715   : > { %v3851_v61 = vpop.eup %3850  ;;  %v1719_v42 = vadd.f32 %v2601_v3, %v1705_v58  ;;  %v1693_v46 = vmul.f32 %v3849_v8, %v4816_v4 }
 0x716   : > { %v1692_v0 = vmul.f32 %v3851_v61, %v4818_v6  ;;  %v1718_v43 = vadd.f32 %v2601_v3, %v1704_v40 }
 0x717   : > { %v1736_v45 = vmul.f32 1.442695, %v1719_v42  ;;  %v1707_v51 = vmul.f32 %v2600_v47, %v1693_v46  ;;  %vm1727_vm1 = vcmp.gt.f32.partialorder %v1719_v42, 0.0 }
 0x718   : > { %v3853_v56 = vpop.eup %3852  ;;  %v1734_v57 = vmul.f32 1.442695, %v1718_v43  ;;  %v1706_v59 = vmul.f32 %v2600_v47, %v1692_v0  ;;  %vm1726_vm2 = vcmp.gt.f32.partialorder %v1718_v43, 0.0 }
 0x719   : > { %v3855_v63 = vpop.eup %3854  ;;  %3860 = vpow2.f32 %v1736_v45  ;;  %v1695_v62 = vmul.f32 %v3853_v56, %v4824_v13  ;;  %v1721_v60 = vadd.f32 %v2601_v3, %v1707_v51 }
 0x71a   : > { %v1694_v5 = vmul.f32 %v3855_v63, %v4826_v16  ;;  %3862 = vpow2.f32 %v1734_v57  ;;  %v1720_v10 = vadd.f32 %v2601_v3, %v1706_v59 }
 0x71b   : > { %v1740_v12 = vmul.f32 1.442695, %v1721_v60  ;;  %v1709_v17 = vmul.f32 %v2600_v47, %v1695_v62  ;;  %vm1729_vm3 = vcmp.gt.f32.partialorder %v1721_v60, 0.0 }
 0x71c   : > { %v3857_v4 = vpop.eup %3856  ;;  %v1738_v20 = vmul.f32 1.442695, %v1720_v10  ;;  %v1708_v6 = vmul.f32 %v2600_v47, %v1694_v5  ;;  %vm1728_vm4 = vcmp.gt.f32.partialorder %v1720_v10, 0.0 }
 0x71d   : > { %v3859_v22 = vpop.eup %3858  ;;  %v1697_v23 = vmul.f32 %v3857_v4, %v4832_v15  ;;  %3864 = vpow2.f32 %v1740_v12  ;;  %v1723_v32 = vadd.f32 %v2601_v3, %v1709_v17 }
 0x71e   : > { %v1696_v25 = vmul.f32 %v3859_v22, %v4834_v18  ;;  %3866 = vpow2.f32 %v1738_v20  ;;  %v1722_v27 = vadd.f32 %v2601_v3, %v1708_v6 }
 0x71f   : > { %v1744_v13 = vmul.f32 1.442695, %v1723_v32  ;;  %v1711_v38 = vmul.f32 %v2600_v47, %v1697_v23  ;;  %vm1731_vm5 = vcmp.gt.f32.partialorder %v1723_v32, 0.0 }
 0x720   : > { %v1742_v24 = vmul.f32 1.442695, %v1722_v27  ;;  %v1710_v16 = vmul.f32 %v2600_v47, %v1696_v25  ;;  %vm1730_vm6 = vcmp.gt.f32.partialorder %v1722_v27, 0.0 }
 0x721   : > { %3868 = vpow2.f32 %v1744_v13  ;;  %v4922_v41 = vadd.f32 %v2601_v3, %v1711_v38 }
 0x722   : > { %3870 = vpow2.f32 %v1742_v24  ;;  %v4924_v36 = vadd.f32 %v2601_v3, %v1710_v16 }
 0x723   : > { %v3861_v29 = vpop.eup %3860  ;;  %v1748_v39 = vmul.f32 1.442695, %v4922_v41  ;;  %vm1733_vm7 = vcmp.gt.f32.partialorder %v4922_v41, 0.0 }
 0x724   : > { %v3863_v15 = vpop.eup %3862  ;;  %v2603_v31 = vadd.f32 -1.0, %v3861_v29  ;;  %v1746_v33 = vmul.f32 1.442695, %v4924_v36  ;;  %vm1732_vm8 = vcmp.gt.f32.partialorder %v4924_v36, 0.0 }
 0x725   : > { %v2602_v18 = vadd.f32 -1.0, %v3863_v15  ;;  %3872 = vpow2.f32 %v1748_v39 }
 0x726   : > { %v1759_v50 = vmul.f32 1.6732632, %v2603_v31  ;;  %3874 = vpow2.f32 %v1746_v33 }
 0x727   : > { %v3865_v35 = vpop.eup %3864  ;;  %v1758_v37 = vmul.f32 1.6732632, %v2602_v18 }
 0x728   : > { %v3867_v47 = vpop.eup %3866  ;;  %v1767_v44 = vsel %vm1727_vm1, %v1719_v42, %v1759_v50  ;;  %v2605_v52 = vadd.f32 -1.0, %v3865_v35  ;;  %v2214_v50 = vld [vmem:[%s5188_s19] sm:$0xff]  ;;  %v2215_v35 = vld [vmem:[%s5188_s19 + $0x8] sm:$0xff] }
 0x729   : > { %v1766_v55 = vsel %vm1726_vm2, %v1718_v43, %v1758_v37  ;;  %v1775_v3 = vmul.f32 1.050701, %v1767_v44  ;;  %v2604_v7 = vadd.f32 -1.0, %v3867_v47  ;;  %v2216_v37 = vld [vmem:[%s5188_s19 + $0x10] sm:$0xff]  ;;  %v3648_v47 = vpack.c.bf16 %v2215_v35, %v2214_v50  ;;  %v2217_v44 = vld [vmem:[%s5188_s19 + $0x18] sm:$0xff] }
 0x72a   : > { %v1774_v58 = vmul.f32 1.050701, %v1766_v55  ;;  %v1761_v8 = vmul.f32 1.6732632, %v2605_v52  ;;  %v3652_v52 = vpack.c.bf16 %v2217_v44, %v2216_v37  ;;  %v2218_v55 = vld [vmem:[%s5188_s19 + $0x20] sm:$0xff] }
 0x72b   : > { %v3869_v40 = vpop.eup %3868  ;;  %v1760_v61 = vmul.f32 1.6732632, %v2604_v7  ;;  %v1783_v56 = vadd.f32 %v1775_v3, %v4758_v30  ;;  %v2219_v3 = vld [vmem:[%s5188_s19 + $0x28] sm:$0xff]  ;;  %v2611_v50 = vld [vmem:[#allocation11] ss:$0 sm:$0xff] }
 0x72c   : > { %v3871_v46 = vpop.eup %3870  ;;  %v1782_v0 = vadd.f32 %v1774_v58, %v4755_v19  ;;  %v1769_v45 = vsel %vm1729_vm3, %v1721_v60, %v1761_v8  ;;  %v2607_v51 = vadd.f32 -1.0, %v3869_v40  ;;  %v3656_v7 = vpack.c.bf16 %v2219_v3, %v2218_v55  ;;  %v2612_v44 = vld [vmem:[#allocation13] ss:$0 sm:$0xff] }
 0x72d   : > { %v1768_v57 = vsel %vm1728_vm4, %v1720_v10, %v1760_v61  ;;  %v1777_v59 = vmul.f32 1.050701, %v1769_v45  ;;  %v2606_v42 = vadd.f32 -1.0, %v3871_v46 }
 0x72e   : > { %3200 = vmatprep.mubr.f32.mxu1 %v1782_v0  ;;  %v1776_v43 = vmul.f32 1.050701, %v1768_v57  ;;  %v1763_v63 = vmul.f32 1.6732632, %v2607_v51 }
 0x72f   : > { %v3873_v62 = vpop.eup %3872  ;;  %3201 = vmatmul.mubr.f32.vlgmr.msra.gmra.mrb[24].mxu1 %v1783_v56  ;;  %v1762_v5 = vmul.f32 1.6732632, %v2606_v42  ;;  %v1785_v30 = vadd.f32 %v1777_v59, %v4767_v26 }
 0x730   : > { %v3875_v12 = vpop.eup %3874  ;;  %v1784_v17 = vadd.f32 %v1776_v43, %v4763_v28  ;;  %v1771_v19 = vsel %vm1731_vm5, %v1723_v32, %v1763_v63  ;;  %v2609_v4 = vadd.f32 -1.0, %v3873_v62  ;;  %3619 = vmatpush3.bf16.msra.mxu1 %v4849_v11 }
 0x731   : > { %v1770_v60 = vsel %vm1730_vm6, %v1722_v27, %v1762_v5  ;;  %v1779_v10 = vmul.f32 1.050701, %v1771_v19  ;;  %v2608_v20 = vadd.f32 -1.0, %v3875_v12  ;;  %3621 = vmatprep.subr.bf16.mxu1 %v4854_v48 }
 0x732   : > { %3203 = vmatprep.mubr.f32.mxu1 %v1784_v17  ;;  %v1778_v6 = vmul.f32 1.050701, %v1770_v60  ;;  %v1765_v22 = vmul.f32 1.6732632, %v2609_v4 }
 0x733   : > { %3204 = vmatmul.mubr.f32.gmra.mrb[26].mxu1 %v1785_v30  ;;  %v1764_v23 = vmul.f32 1.6732632, %v2608_v20  ;;  %v1787_v26 = vadd.f32 %v1779_v10, %v4780_v54  ;;  %v1934_v54 = vld [vmem:[%s5140_s12 + $0x70] sm:$0xff] }
 0x734   : > { %v1786_v28 = vadd.f32 %v1778_v6, %v4774_v34  ;;  %v1773_v11 = vsel %vm1733_vm7, %v4922_v41, %v1765_v22  ;;  %3623 = vmatpush3.bf16.msra.mxu1 %v4854_v48  ;;  %v2610_v48 = vld [vmem:[#allocation10] ss:$0 sm:$0xff]  ;;  %v2220_v6 = vld [vmem:[%s5188_s19 + $0x30] sm:$0xff]  ;;  %v2221_v22 = vld [vmem:[%s5188_s19 + $0x38] sm:$0xff] }
 0x735   : > { %v1772_v32 = vsel %vm1732_vm8, %v4924_v36, %v1764_v23  ;;  %v1781_v25 = vmul.f32 1.050701, %v1773_v11  ;;  %3625 = vmatprep.subr.bf16.mxu1 %v4866_v53  ;;  %v3660_v23 = vpack.c.bf16 %v2221_v22, %v2220_v6  ;;  %v2223_v11 = vld [vmem:[%s5188_s19 + $0x48] sm:$0xff] }
 0x736   : > { %3206 = vmatprep.mubr.f32.mxu1 %v1786_v28  ;;  %v1780_v27 = vmul.f32 1.050701, %v1772_v32  ;;  %v2222_v28 = vld [vmem:[%s5188_s19 + $0x40] sm:$0xff]  ;;  %v2224_v32 = vld [vmem:[%s5188_s19 + $0x50] sm:$0xff] }
 0x737   : > { %3207 = vmatmul.mubr.f32.gmra.mrb[28].mxu1 %v1787_v26  ;;  %v1789_v34 = vadd.f32 %v1781_v25, %v4791_v49  ;;  %v3664_v26 = vpack.c.bf16 %v2223_v11, %v2222_v28  ;;  %v2225_v25 = vld [vmem:[%s5188_s19 + $0x58] sm:$0xff] }
 0x738   : > { %v1788_v13 = vadd.f32 %v1780_v27, %v4787_v1  ;;  %3627 = vmatpush3.bf16.msra.mxu1 %v4866_v53  ;;  %v1935_v1 = vld [vmem:[%s5140_s12 + $0x78] sm:$0xff]  ;;  %v3668_v27 = vpack.c.bf16 %v2225_v25, %v2224_v32 }
 0x739   : > { %3629 = vmatprep.subr.bf16.mxu1 %v4876_v2  ;;  %v3612_v49 = vpack.c.bf16 %v1935_v1, %v1934_v54  ;;  %v2228_v1 = vld [vmem:[%s5188_s19 + $0x70] sm:$0xff] }
 0x73a   : > { %3209 = vmatprep.mubr.f32.mxu1 %v1788_v13  ;;  %v2226_v13 = vld [vmem:[%s5188_s19 + $0x60] sm:$0xff] }
 0x73b   : > { %3210 = vmatmul.mubr.f32.gmra.mrb[30].mxu1 %v1789_v34  ;;  %3613 = vmatprep.subr.bf16.mxu0 %v3612_v49  ;;  %v2227_v34 = vld [vmem:[%s5188_s19 + $0x68] sm:$0xff] }
 0x73c   : > { %3631 = vmatpush3.bf16.msra.mxu1 %v4876_v2  ;;  %3615 = vmatpush3.bf16.msra.mxu0 %v3612_v49  ;;  %v3672_v54 = vpack.c.bf16 %v2227_v34, %v2226_v13 }
 0x73d   : > { %3633 = vmatprep.subr.bf16.mxu1 %v4886_v9  ;;  %3649 = vmatprep.subr.bf16.mxu0 %v3648_v47 }
 0x740   : > { %3635 = vmatpush3.bf16.msra.mxu1 %v4886_v9 }
 0x741   : > { %3637 = vmatprep.subr.bf16.mxu1 %v4896_v14 }
 0x744   : > { %3639 = vmatpush3.bf16.msra.mxu1 %v4896_v14 }
 0x745   : > { %3641 = vmatprep.subr.bf16.mxu1 %v4906_v21 }
 0x748   : > { %3643 = vmatpush3.bf16.msra.mxu1 %v4906_v21 }
 0x749   : > { %3645 = vmatprep.subr.bf16.mxu1 %v3612_v49 }
 0x74c   : > { %3647 = vmatpush3.bf16.msra.mxu1 %v3612_v49  ;;  %v2229_v49 = vld [vmem:[%s5188_s19 + $0x78] sm:$0xff] }
 0x802   : > { %v3202_v53 = vpop.f32.mrb[24].mxu1 }
 0x803   : > { %v1879_v2 = vpop.f32.mrb[25].mxu1  ;;  %v1885_v14 = vadd.f32 %v3202_v53, %v2610_v48 }
 0x804   : > { %v1880_v9 = vadd.f32 %v2610_v48, %v1879_v2 }
 0x806   : > { %v3205_v38 = vpop.f32.mrb[26].mxu1  ;;  %3244 = vmatprep.mubr.f32.mxu0 %v1880_v9 }
 0x807   : > { %v1889_v21 = vpop.f32.mrb[27].mxu1  ;;  %3245 = vmatmul.mubr.f32.vlgmr.msra.gmra.mrb[32].mxu0 %v1885_v14  ;;  %v1895_v16 = vadd.f32 %v3205_v38, %v2610_v48 }
 0x808   : > { %v1890_v24 = vadd.f32 %v2610_v48, %v1889_v21  ;;  %3651 = vmatpush3.bf16.msra.mxu0 %v3648_v47 }
 0x809   : > { %3653 = vmatprep.subr.bf16.mxu0 %v3652_v52 }
 0x80a   : > { %v3208_v41 = vpop.f32.mrb[28].mxu1  ;;  %3247 = vmatprep.mubr.f32.mxu0 %v1890_v24 }
 0x80b   : > { %v1899_v36 = vpop.f32.mrb[29].mxu1  ;;  %3248 = vmatmul.mubr.f32.gmra.mrb[34].mxu0 %v1895_v16  ;;  %v1905_v39 = vadd.f32 %v3208_v41, %v2610_v48 }
 0x80c   : > { %v1900_v29 = vadd.f32 %v2610_v48, %v1899_v36  ;;  %3655 = vmatpush3.bf16.msra.mxu0 %v3652_v52 }
 0x80d   : > { %3657 = vmatprep.subr.bf16.mxu0 %v3656_v7 }
 0x80e   : > { %v3211_v15 = vpop.f32.mrb[30].mxu1  ;;  %3250 = vmatprep.mubr.f32.mxu0 %v1900_v29 }
 0x80f   : > { %v1909_v31 = vpop.f32.mrb[31].mxu1  ;;  %3251 = vmatmul.mubr.f32.gmra.mrb[36].mxu0 %v1905_v39  ;;  %v1915_v18 = vadd.f32 %v3211_v15, %v2610_v48 }
 0x810   : > { %v1910_v33 = vadd.f32 %v2610_v48, %v1909_v31  ;;  %3659 = vmatpush3.bf16.msra.mxu0 %v3656_v7  ;;  %v3676_v48 = vpack.c.bf16 %v2229_v49, %v2228_v1 }
 0x811   : > { %3661 = vmatprep.subr.bf16.mxu0 %v3660_v23 }
 0x812   : > { %3253 = vmatprep.mubr.f32.mxu0 %v1910_v33 }
 0x813   : > { %3254 = vmatmul.mubr.f32.gmra.mrb[38].mxu0 %v1915_v18 }
 0x814   : > { %3663 = vmatpush3.bf16.msra.mxu0 %v3660_v23 }
 0x815   : > { %3665 = vmatprep.subr.bf16.mxu0 %v3664_v26 }
 0x818   : > { %3667 = vmatpush3.bf16.msra.mxu0 %v3664_v26 }
 0x819   : > { %3669 = vmatprep.subr.bf16.mxu0 %v3668_v27 }
 0x81c   : > { %3671 = vmatpush3.bf16.msra.mxu0 %v3668_v27 }
 0x81d   : > { %3673 = vmatprep.subr.bf16.mxu0 %v3672_v54 }
 0x820   : > { %3675 = vmatpush3.bf16.msra.mxu0 %v3672_v54 }
 0x821   : > { %3677 = vmatprep.subr.bf16.mxu0 %v3676_v48 }
 0x824   : > { %3679 = vmatpush3.bf16.msra.mxu0 %v3676_v48 }
 0x8da   : > { %v3246_v58 = vpop.f32.mrb[32].mxu0 }
 0x8db   : > { %v4977_v8 = vsub.f32 %v1885_v14, %v3246_v58  ;;  %v2002_v40 = vpop.f32.mrb[33].mxu0 }
 0x8dc   : > { %v4979_v61 = vsub.f32 %v1880_v9, %v2002_v40 }
 0x8dd   : > { %v2050_v45 = vmul.f32 %v4977_v8, %v4977_v8 }
 0x8de   : > { %v2049_v46 = vmul.f32 %v4979_v61, %v4979_v61  ;;  %v3249_v0 = vpop.f32.mrb[34].mxu0 }
 0x8df   : > { %v4985_v51 = vsub.f32 %v1895_v16, %v3249_v0  ;;  %v2012_v56 = vpop.f32.mrb[35].mxu0 }
 0x8e0   : > { %v4987_v57 = vsub.f32 %v1890_v24, %v2012_v56  ;;  %3288 = vmatprep.mubr.f32.mxu1 %v2049_v46 }
 0x8e1   : > { %3289 = vmatmul.mubr.f32.vlgmr.msra.gmra.mrb[32].mxu1 %v2050_v45  ;;  %v2052_v43 = vmul.f32 %v4985_v51, %v4985_v51 }
 0x8e2   : > { %v2051_v59 = vmul.f32 %v4987_v57, %v4987_v57  ;;  %v3252_v42 = vpop.f32.mrb[36].mxu0 }
 0x8e3   : > { %v4993_v63 = vsub.f32 %v1905_v39, %v3252_v42  ;;  %v2022_v62 = vpop.f32.mrb[37].mxu0 }
 0x8e4   : > { %v4995_v5 = vsub.f32 %v1900_v29, %v2022_v62  ;;  %3291 = vmatprep.mubr.f32.mxu1 %v2051_v59 }
 0x8e5   : > { %3292 = vmatmul.mubr.f32.gmra.mrb[34].mxu1 %v2052_v43  ;;  %v2054_v19 = vmul.f32 %v4993_v63, %v4993_v63 }
 0x8e6   : > { %v2053_v12 = vmul.f32 %v4995_v5, %v4995_v5  ;;  %v3255_v17 = vpop.f32.mrb[38].mxu0 }
 0x8e7   : > { %v5001_v4 = vsub.f32 %v1915_v18, %v3255_v17  ;;  %v2032_v30 = vpop.f32.mrb[39].mxu0 }
 0x8e8   : > { %v5003_v60 = vsub.f32 %v1910_v33, %v2032_v30  ;;  %3294 = vmatprep.mubr.f32.mxu1 %v2053_v12 }
 0x8e9   : > { %3295 = vmatmul.mubr.f32.gmra.mrb[36].mxu1 %v2054_v19  ;;  %v2056_v20 = vmul.f32 %v5001_v4, %v5001_v4 }
 0x8ea   : > { %v2055_v10 = vmul.f32 %v5003_v60, %v5003_v60 }
 0x8ec   : > { %3297 = vmatprep.mubr.f32.mxu1 %v2055_v10 }
 0x8ed   : > { %3298 = vmatmul.mubr.f32.gmra.mrb[38].mxu1 %v2056_v20 }
 0x9b4   : > { %v3290_v53 = vpop.f32.mrb[32].mxu1 }
 0x9b5   : > { %v2129_v2 = vadd.f32 1e-05, %v3290_v53  ;;  %v2123_v9 = vpop.f32.mrb[33].mxu1 }
 0x9b6   : > { %v2124_v14 = vadd.f32 1e-05, %v2123_v9 }
 0x9b7   : > { %3876 = vrsqrt.f32 %v2129_v2 }
 0x9b8   : > { %3878 = vrsqrt.f32 %v2124_v14  ;;  %v3293_v38 = vpop.f32.mrb[34].mxu1 }
 0x9b9   : > { %v2139_v21 = vadd.f32 1e-05, %v3293_v38  ;;  %v2133_v24 = vpop.f32.mrb[35].mxu1 }
 0x9ba   : > { %v2134_v16 = vadd.f32 1e-05, %v2133_v24 }
 0x9bb   : > { %3880 = vrsqrt.f32 %v2139_v21 }
 0x9bc   : > { %3882 = vrsqrt.f32 %v2134_v16  ;;  %v3296_v41 = vpop.f32.mrb[36].mxu1 }
 0x9bd   : > { %v2149_v36 = vadd.f32 1e-05, %v3296_v41  ;;  %v2143_v29 = vpop.f32.mrb[37].mxu1 }
 0x9be   : > { %v2144_v39 = vadd.f32 1e-05, %v2143_v29 }
 0x9bf   : > { %3884 = vrsqrt.f32 %v2149_v36 }
 0x9c0   : > { %3886 = vrsqrt.f32 %v2144_v39  ;;  %v3299_v15 = vpop.f32.mrb[38].mxu1 }
 0x9c1   : > { %v3877_v31 = vpop.eup %3876  ;;  %v2159_v33 = vadd.f32 1e-05, %v3299_v15  ;;  %v2153_v18 = vpop.f32.mrb[39].mxu1 }
 0x9c2   : > { %v3879_v35 = vpop.eup %3878  ;;  %v2171_v37 = vmul.f32 %v3877_v31, %v4977_v8  ;;  %v2154_v47 = vadd.f32 1e-05, %v2153_v18 }
 0x9c3   : > { %3888 = vrsqrt.f32 %v2159_v33  ;;  %v2170_v52 = vmul.f32 %v3879_v35, %v4979_v61 }
 0x9c4   : > { %3890 = vrsqrt.f32 %v2154_v47  ;;  %v2185_v55 = vmul.f32 %v2611_v50, %v2171_v37 }
 0x9c5   : > { %v3881_v3 = vpop.eup %3880  ;;  %v2184_v7 = vmul.f32 %v2611_v50, %v2170_v52 }
 0x9c6   : > { %v3883_v58 = vpop.eup %3882  ;;  %v2199_v40 = vadd.f32 %v2612_v44, %v2185_v55  ;;  %v2173_v46 = vmul.f32 %v3881_v3, %v4985_v51 }
 0x9c7   : > { %v2198_v0 = vadd.f32 %v2612_v44, %v2184_v7  ;;  %v2172_v45 = vmul.f32 %v3883_v58, %v4987_v57 }
 0x9c8   : > { %2207 = vst [vmem:[%s5046_s30 + $0x8] sm:$0xff] %v2199_v40  ;;  %v2187_v8 = vmul.f32 %v2611_v50, %v2173_v46 }
 0x9c9   : > { %v3885_v61 = vpop.eup %3884  ;;  %2206 = vst [vmem:[%s5046_s30] sm:$0xff] %v2198_v0  ;;  %3332 = vmatprep.mubr.f32.mxu0 %v2198_v0  ;;  %v2186_v56 = vmul.f32 %v2611_v50, %v2172_v45 }
 0x9ca   : > { %v3887_v59 = vpop.eup %3886  ;;  %3333 = vmatmul.mubr.f32.vlgmr.msra.gmra.mrb[40].mxu0 %v2199_v40  ;;  %v2201_v42 = vadd.f32 %v2612_v44, %v2187_v8  ;;  %v2175_v51 = vmul.f32 %v3885_v61, %v4993_v63 }
 0x9cb   : > { %v2200_v43 = vadd.f32 %v2612_v44, %v2186_v56  ;;  %v2174_v57 = vmul.f32 %v3887_v59, %v4995_v5 }
 0x9cc   : > { %2209 = vst [vmem:[%s5046_s30 + $0x18] sm:$0xff] %v2201_v42  ;;  %v2189_v62 = vmul.f32 %v2611_v50, %v2175_v51 }
 0x9cd   : > { %v3889_v12 = vpop.eup %3888  ;;  %2208 = vst [vmem:[%s5046_s30 + $0x10] sm:$0xff] %v2200_v43  ;;  %3335 = vmatprep.mubr.f32.mxu0 %v2200_v43  ;;  %v2188_v17 = vmul.f32 %v2611_v50, %v2174_v57 }
 0x9ce   : > { %v3891_v19 = vpop.eup %3890  ;;  %3336 = vmatmul.mubr.f32.gmra.mrb[42].mxu0 %v2201_v42  ;;  %v2203_v30 = vadd.f32 %v2612_v44, %v2189_v62  ;;  %v2177_v10 = vmul.f32 %v3889_v12, %v5001_v4 }
 0x9cf   : > { %v2202_v63 = vadd.f32 %v2612_v44, %v2188_v17  ;;  %v2176_v20 = vmul.f32 %v3891_v19, %v5003_v60 }
 0x9d0   : > { %2211 = vst [vmem:[%s5046_s30 + $0x28] sm:$0xff] %v2203_v30  ;;  %v2191_v5 = vmul.f32 %v2611_v50, %v2177_v10 }
 0x9d1   : > { %2210 = vst [vmem:[%s5046_s30 + $0x20] sm:$0xff] %v2202_v63  ;;  %3338 = vmatprep.mubr.f32.mxu0 %v2202_v63  ;;  %v2190_v6 = vmul.f32 %v2611_v50, %v2176_v20 }
 0x9d2   : > { %3339 = vmatmul.mubr.f32.gmra.mrb[44].mxu0 %v2203_v30  ;;  %v2205_v22 = vadd.f32 %v2612_v44, %v2191_v5 }
 0x9d3   : > { %v2204_v23 = vadd.f32 %v2612_v44, %v2190_v6 }
 0x9d4   : > { %2213 = vst [vmem:[%s5046_s30 + $0x38] sm:$0xff] %v2205_v22 }
 0x9d5   : > { %2212 = vst [vmem:[%s5046_s30 + $0x30] sm:$0xff] %v2204_v23  ;;  %3341 = vmatprep.mubr.f32.mxu0 %v2204_v23 }
 0x9d6   : > { %3342 = vmatmul.mubr.f32.gmra.mrb[46].mxu0 %v2205_v22 }
 0x9d7   : > { %4101 = shalt.err (!%p4098_p9)
}
 0x9d8   : > { %s4102_s16 = scalar_lea.hbm %s5065_s20, 1024  ;;  %s4106_s21 = scalar_lea.hbm %s5192_s29, 2048 }
 0x9d9   : > { %p4103_p10 = scmp.ne.s32.totalorder %s5065_s20, %s4102_s16  ;;  %p4107_p1 = scmp.lt.u32.totalorder %s5065_s20, %s5192_s29 }
 0x9da   : > { %p4108_p2 = scmp.lt.u32.totalorder %s4106_s21, %s4102_s16  ;;  %p4110_p4 = scmp.lt.u32.totalorder %s4102_s16, %s5065_s20 }
 0x9db   : > { %p4104_p13 = pnand %p4103_p10, %p5193_p7 }
 0x9dc   : > { %p4109_p3 = por %p4108_p2, %p4107_p1 }
 0x9dd   : > { %p4105_p12 = pneg %p4104_p13 }
 0x9de   : > { %p4111_p8 = por %p4110_p4, %p4109_p3 }
 0x9e0   : > { %p4112_p11 = pnand %p4111_p8, %p4105_p12 }
 0x9e2   : > { %4115 = shalt.err (!%p4112_p11)
}
 0x9e3   : > { %s4180_s23 = smov 128   ;;  %s4181_s22 = smov 8   ;;  %vm2342_vm9 = vcmask 261120  }
 0x9e4   : > { %3708 = dma.vmem_to_hbm [thread:$0]  (%p5193_p7), %s5067_s24, 1024, %s5065_s20, %s5071_s15, %s4180_s23, %s4180_s23, %s4181_s22  }
 0x9e5   : > { %s5194_s17 = sld [smem:[#allocation30_spill]]  ;;  %s5195_s16 = sld [smem:[#allocation32_spill]] }
 0x9eb   : > { %v2613_v4 = vld [vmem:[%s5194_s17] ss:$0 sm:$0xff]  ;;  %s631_s21 = scalar_lea.vmem %s5195_s16, %s2550_s26 }
 0xa9d   : > { %v3334_v60 = vpop.f32.mrb[40].mxu0 }
 0xa9e   : > { %v2309_v28 = vadd.f32 %v3334_v60, %v2613_v4  ;;  %v2303_v11 = vpop.f32.mrb[41].mxu0 }
 0xa9f   : > { %v2304_v26 = vadd.f32 %v2613_v4, %v2303_v11 }
 0xaa0   : > { %2344 = vst.msk [vmem:[%s631_s21 + $0x8] sm:$0xff] %vm2342_vm9, %v2309_v28 }
 0xaa1   : > { %2343 = vst.msk [vmem:[%s631_s21] sm:$0xff] %vm2342_vm9, %v2304_v26  ;;  %v3337_v32 = vpop.f32.mrb[42].mxu0 }
 0xaa2   : > { %v2319_v25 = vadd.f32 %v3337_v32, %v2613_v4  ;;  %v2313_v27 = vpop.f32.mrb[43].mxu0 }
 0xaa3   : > { %v2314_v13 = vadd.f32 %v2613_v4, %v2313_v27 }
 0xaa4   : > { %2346 = vst.msk [vmem:[%s631_s21 + $0x18] sm:$0xff] %vm2342_vm9, %v2319_v25 }
 0xaa5   : > { %2345 = vst.msk [vmem:[%s631_s21 + $0x10] sm:$0xff] %vm2342_vm9, %v2314_v13  ;;  %v3340_v34 = vpop.f32.mrb[44].mxu0 }
 0xaa6   : > { %v2329_v54 = vadd.f32 %v3340_v34, %v2613_v4  ;;  %v2323_v1 = vpop.f32.mrb[45].mxu0 }
 0xaa7   : > { %v2324_v49 = vadd.f32 %v2613_v4, %v2323_v1 }
 0xaa8   : > { %2348 = vst.msk [vmem:[%s631_s21 + $0x28] sm:$0xff] %vm2342_vm9, %v2329_v54 }
 0xaa9   : > { %2347 = vst.msk [vmem:[%s631_s21 + $0x20] sm:$0xff] %vm2342_vm9, %v2324_v49  ;;  %v3343_v48 = vpop.f32.mrb[46].mxu0 }
 0xaaa   : > { %v2339_v53 = vadd.f32 %v3343_v48, %v2613_v4  ;;  %v2333_v2 = vpop.f32.mrb[47].mxu0 }
 0xaab   : > { %v2334_v9 = vadd.f32 %v2613_v4, %v2333_v2 }
 0xaac   : > { %2350 = vst.msk [vmem:[%s631_s21 + $0x38] sm:$0xff] %vm2342_vm9, %v2339_v53 }
 0xaad   : > { %2349 = vst.msk [vmem:[%s631_s21 + $0x30] sm:$0xff] %vm2342_vm9, %v2334_v9 }
 0xaae PF: > { %s5196_s18 = sld [smem:[#allocation23_spill]]  ;;  %s5197_s26 = sld [smem:[#allocation20_spill]] }
 0xaaf   : > { %s5198_s13 = sld [smem:[#allocation27_spill]] }
 0xab4   : > { %p3750_p7 = scmp.ge.s32.totalorder %s5196_s18, 2  ;;  %s2389_s24 = sand.u32 1, %s5197_s26  }
 0xab5   : > { %p5199_p5 = scmp.ne.s32.totalorder %s5198_s13, 0  ;;  %s2390_s20 = scalar_lea.sflag [#allocation4], %s2389_s24 }
 0xab7   : > { %p3733_p6 = pnand %p3750_p7, %p5199_p5 }
 0xab9   : > { %4149 = dma.done.wait (!%p3733_p6), %s2390_s20, 1024  }
 0xaba   : > { %4151 = vsyncadd (!%p3733_p6), %s2390_s20, 4294966272  ;;  %s5200_s24 = sld [smem:[#allocation24_spill]]  ;;  %s5201_s21 = sld [smem:[#allocation21_spill]] }
 0xabb   : > { %s5202_s22 = sld [smem:[#allocation22_spill]]  ;;  %s5203_s23 = sld [smem:[#allocation25_spill]] }
 0xac0   : > { %p31_p0 = scmp.ge.s32.totalorder %s5200_s24, 4  }
 0xac2   :  { %33 = sbr.rel (!%p31_p0) target bundleno = 13 (0xd), region = 160 }
 0xac9   :  { %2403 = vsyncpa [#allocation3], 1 }
 0xaca   :  { %2405 = vsyncpa [#allocation3 + $0x1], 1 }
 0xacb   :  { %2406 = vsyncpa [#allocation6], 1 }
 0xacc   :  { %2407 = vsyncpa [#allocation9], 1 }
 0xacd   :  { %2408 = vsyncpa [#allocation12], 1 }
 0xace   :  { %2409 = vsyncpa [#allocation4], 1 }
 0xacf   :  { %2411 = vsyncpa [#allocation4 + $0x1], 1 }

</bundles_post_ra>
